<compile_context>
chip_gen: v7x
topology: tpu7x:2x2x1
jax: 0.10.0
libtpu: 0.0.40
codegen_flags: <defaults>
</compile_context>

<pallas_src>
import functools
import math

import jax
import jax.numpy as jnp
import numpy as np
from jax import lax
from jax.experimental import pallas as pl
from jax.experimental.pallas import tpu as pltpu


# --------------------------------------------------------------------------
# Fused kernel: QKV projection + per-head attention + output projection.
# One (Bt, S, D) batch tile per grid step.
# --------------------------------------------------------------------------
def _mha_fused_kernel(*refs, num_heads, compute_dtype, have_mask):
    """Per grid step:
      q/k/v_ref : (Bt, S, D)     mask_ref : (Bt, Sm, S), Sm in {1, S} (optional)
      w*_ref    : (D, D)         b*_ref   : (1, D)
      o_ref     : (Bt, S, D)
    """
    if have_mask:
        (q_ref, k_ref, v_ref, mask_ref,
         wq_ref, bq_ref, wk_ref, bk_ref, wv_ref, bv_ref,
         wo_ref, bo_ref, o_ref) = refs
    else:
        (q_ref, k_ref, v_ref,
         wq_ref, bq_ref, wk_ref, bk_ref, wv_ref, bv_ref,
         wo_ref, bo_ref, o_ref) = refs
        mask_ref = None

    Bt, S, D = q_ref.shape
    depth = D // num_heads
    scale = 1.0 / math.sqrt(depth)
    cdt = compute_dtype

    # --- all-head, all-row projections: single (Bt*S, D) @ (D, D) MXU matmuls ---
    xq = q_ref[...].reshape(Bt * S, D).astype(cdt)
    xk = k_ref[...].reshape(Bt * S, D).astype(cdt)
    xv = v_ref[...].reshape(Bt * S, D).astype(cdt)
    wq = wq_ref[...].astype(cdt)   # no-op cast: weights are pre-cast in the wrapper
    wk = wk_ref[...].astype(cdt)
    wv = wv_ref[...].astype(cdt)
    wo = wo_ref[...].astype(cdt)

    q = jnp.dot(xq, wq, preferred_element_type=jnp.float32) + bq_ref[...]
    k = jnp.dot(xk, wk, preferred_element_type=jnp.float32) + bk_ref[...]
    v = jnp.dot(xv, wv, preferred_element_type=jnp.float32) + bv_ref[...]
    q = q * jnp.float32(scale)           # fold 1/sqrt(depth) into q once

    # --- per-batch-row attention (heads statically unrolled) ---
    # TODO(synk): for num_heads >= 8 switch the head unroll to lax.fori_loop(unroll=..)
    # with pl.ds(h*depth, depth) slices to bound vreg live ranges.
    for bi in range(Bt):
        r0 = bi * S
        bias = None
        if mask_ref is not None:
            # Hoisted out of the head loop: additive bias, computed once per row.
            bias = jnp.where(mask_ref[bi] > 0, jnp.float32(0.0), jnp.float32(-1e9))

        head_outs = []
        for h in range(num_heads):
            lo = h * depth
            qh = q[r0:r0 + S, lo:lo + depth].astype(cdt)
            kh = k[r0:r0 + S, lo:lo + depth].astype(cdt)
            vh = v[r0:r0 + S, lo:lo + depth].astype(cdt)

            # q @ k^T without explicit transpose: contract the last dims of both.
            scores = lax.dot_general(qh, kh, (((1,), (1,)), ((), ())),
                                     preferred_element_type=jnp.float32)   # (S, S)
            if bias is not None:
                scores = scores + bias   # masked_fill(mask==0, -1e9) semantics

            m = jnp.max(scores, axis=-1, keepdims=True)
            e = jnp.exp(scores - m)
            attn = e / jnp.sum(e, axis=-1, keepdims=True)   # exact softmax (no approx recip)

            head_outs.append(jnp.dot(attn.astype(cdt), vh,
                                     preferred_element_type=jnp.float32))  # (S, depth)

        # concat(heads) -> ONE full-K (S, D) @ (D, D) output projection.
        concat = jnp.concatenate(head_outs, axis=-1).astype(cdt)           # (S, D)
        out = jnp.dot(concat, wo, preferred_element_type=jnp.float32) + bo_ref[...]
        o_ref[bi] = out.astype(o_ref.dtype)


# --------------------------------------------------------------------------
# Wrapper
# --------------------------------------------------------------------------
def _pick_batch_tile(batch, seq, target_rows=256, max_rows=2048):
    """Smallest divisor of `batch` whose row block (Bt*seq) reaches target_rows,
    capped at max_rows (VMEM)."""
    best = 1
    for bt in range(1, batch + 1):
        if batch % bt:
            continue
        if bt * seq <= max_rows:
            best = bt
        if bt * seq >= target_rows:
            break
    return best


def multi_head_attention(query, key, value, mask, params, *,
                         num_heads, compute_dtype=jnp.float32):
    """query/key/value: [B, S, D]; mask: [B,1,1,S] (padding), [B,1,S,S] (look-ahead), or None."""
    B, S, D = query.shape
    assert D % num_heads == 0

    Bt = _pick_batch_tile(B, S)
    grid = (B // Bt,)

    # Weights pre-cast to the MXU operand dtype (halves weight DMA + VMEM in bf16
    # mode); biases stay f32 (they are added to f32 accumulators).
    wq = params["wq"].astype(compute_dtype)
    wk = params["wk"].astype(compute_dtype)
    wv = params["wv"].astype(compute_dtype)
    wo = params["wo"].astype(compute_dtype)
    bq, bk, bv, bo = (params[n].reshape(1, D).astype(jnp.float32)
                      for n in ("bq", "bk", "bv", "bo"))

    have_mask = mask is not None
    mask_args, mask_specs = [], []
    if have_mask:
        # Slim mask: [B, Sm, S] with Sm == 1 (padding) or Sm == S (look-ahead).
        mask_s = mask.astype(jnp.float32).reshape(B, mask.shape[-2], mask.shape[-1])
        Sm = mask_s.shape[1]
        mask_args = [mask_s]
        mask_specs = [pl.BlockSpec((Bt, Sm, S), lambda b: (b, 0, 0))]
        # TODO(synk): generate causal masks in-kernel via broadcasted_iota (and pass
        # padding masks as int8) to remove the O(B*S^2) f32 mask DMA at long S.

    kernel = functools.partial(_mha_fused_kernel, num_heads=num_heads,
                               compute_dtype=compute_dtype, have_mask=have_mask)

    batch_spec = pl.BlockSpec((Bt, S, D), lambda b: (b, 0, 0))
    # Constant index maps + single buffering: weights stay VMEM-resident and are not
    # pointlessly double-buffered.
    w_spec = pl.BlockSpec((D, D), lambda b: (0, 0), pipeline_mode=pl.Buffered(1))
    b_spec = pl.BlockSpec((1, D), lambda b: (0, 0), pipeline_mode=pl.Buffered(1))

    # TODO(synk): for long sequences (S >~ 1-2K, esp. v7x's 64 MiB VMEM) switch to a
    # flash-style grid (parallel q-tiles, arbitrary k-tiles, online softmax); that also
    # adds a second parallel axis to feed both v7x TensorCores.
    # TODO(synk): when query is key is value (self-attention), fuse Wq|Wk|Wv into one
    # (D, 3D) weight so the projection is a single N=3D matmul.
    return pl.pallas_call(
        kernel,
        out_shape=jax.ShapeDtypeStruct((B, S, D), query.dtype),
        grid_spec=pltpu.PrefetchScalarGridSpec(
            num_scalar_prefetch=0,
            grid=grid,
            in_specs=[
                batch_spec, batch_spec, batch_spec,   # query, key, value
                *mask_specs,                          # slim mask (only when present)
                w_spec, b_spec,                       # Wq, bq
                w_spec, b_spec,                       # Wk, bk
                w_spec, b_spec,                       # Wv, bv
                w_spec, b_spec,                       # Wo, bo
            ],
            out_specs=pl.BlockSpec((Bt, S, D), lambda b: (b, 0, 0)),
        ),
        compiler_params=pltpu.CompilerParams(
            dimension_semantics=("parallel",),
            vmem_limit_bytes=64 * 1024 * 1024),
    )(query, key, value, *mask_args,
      wq, bq, wk, bk, wv, bv, wo, bo)


# --------------------------------------------------------------------------
# Pure-JAX reference (mirrors the PyTorch module)
# --------------------------------------------------------------------------
def _reference(query, key, value, mask, params, *, num_heads):
    B, S, D = query.shape
    depth = D // num_heads

    def dense(x, w, b):
        return x @ w + b

    def split(x):
        return x.reshape(B, S, num_heads, depth).transpose(0, 2, 1, 3)

    q = split(dense(query, params["wq"], params["bq"]))
    k = split(dense(key, params["wk"], params["bk"]))
    v = split(dense(value, params["wv"], params["bv"]))

    scores = jnp.einsum("bhqd,bhkd->bhqk", q, k) / math.sqrt(depth)
    if mask is not None:
        scores = jnp.where(mask > 0, scores, -1e9)
    attn = jax.nn.softmax(scores, axis=-1)
    out = jnp.einsum("bhqk,bhkd->bhqd", attn, v)
    out = out.transpose(0, 2, 1, 3).reshape(B, S, D)
    return dense(out, params["wo"], params["bo"])


def _init_params(key, d_model):
    # Deterministic init mimicking nn.Linear default (uniform +-1/sqrt(in)).
    ks = jax.random.split(key, 8)
    bound = 1.0 / math.sqrt(d_model)

    def u(k, shape):
        return jax.random.uniform(k, shape, jnp.float32, -bound, bound)

    return {
        "wq": u(ks[0], (d_model, d_model)), "bq": u(ks[1], (d_model,)),
        "wk": u(ks[2], (d_model, d_model)), "bk": u(ks[3], (d_model,)),
        "wv": u(ks[4], (d_model, d_model)), "bv": u(ks[5], (d_model,)),
        "wo": u(ks[6], (d_model, d_model)), "bo": u(ks[7], (d_model,)),
    }


if __name__ == "__main__":
    B, S, d_model, num_heads = 2, 8, 256, 2   # depth = 128 (TPU lane-aligned)

    root = jax.random.PRNGKey(0)
    k_q, k_k, k_v, k_p = jax.random.split(root, 4)

    query = jax.random.normal(k_q, (B, S, d_model), jnp.float32)
    key = jax.random.normal(k_k, (B, S, d_model), jnp.float32)
    value = jax.random.normal(k_v, (B, S, d_model), jnp.float32)
    params = _init_params(k_p, d_model)

    # Padding mask [B, 1, 1, S]: last two key positions of batch 1 are masked.
    pad_mask = jnp.ones((B, 1, 1, S), jnp.float32).at[1, :, :, -2:].set(0.0)
    # Look-ahead (causal) mask [B, 1, S, S].
    causal_mask = jnp.broadcast_to(jnp.tril(jnp.ones((S, S), jnp.float32)),
                                   (B, 1, S, S))

    # f32 path: exact softmax -> should match the reference tightly.
    for m in (pad_mask, causal_mask, None):
        out = multi_head_attention(query, key, value, m, params, num_heads=num_heads)
        out = jax.block_until_ready(out)
        ref = _reference(query, key, value, m, params, num_heads=num_heads)
        np.testing.assert_allclose(np.asarray(out), np.asarray(ref),
                                   rtol=5e-4, atol=5e-4)

    # bf16 MXU-operand path (softmax / accumulation stay f32): confirm it runs & is finite.
    out_bf16 = multi_head_attention(query, key, value, causal_mask, params,
                                    num_heads=num_heads, compute_dtype=jnp.bfloat16)
    out_bf16 = jax.block_until_ready(out_bf16)
    assert bool(jnp.all(jnp.isfinite(out_bf16.astype(jnp.float32))))

    print("KERNEL_OK")
</pallas_src>

<mosaic_0001>
module attributes {stable_mosaic.version = 11 : i64} {
  func.func @_mha_fused_kernel(%arg0: i32, %arg1: memref<2x8x256xf32, #tpu.memory_space<vmem>>, %arg2: memref<2x8x256xf32, #tpu.memory_space<vmem>>, %arg3: memref<2x8x256xf32, #tpu.memory_space<vmem>>, %arg4: memref<2x1x8xf32, #tpu.memory_space<vmem>>, %arg5: memref<256x256xf32, #tpu.memory_space<vmem>>, %arg6: memref<1x256xf32, #tpu.memory_space<vmem>>, %arg7: memref<256x256xf32, #tpu.memory_space<vmem>>, %arg8: memref<1x256xf32, #tpu.memory_space<vmem>>, %arg9: memref<256x256xf32, #tpu.memory_space<vmem>>, %arg10: memref<1x256xf32, #tpu.memory_space<vmem>>, %arg11: memref<256x256xf32, #tpu.memory_space<vmem>>, %arg12: memref<1x256xf32, #tpu.memory_space<vmem>>, %arg13: memref<2x8x256xf32, #tpu.memory_space<vmem>>) attributes {dimension_semantics = [#tpu.dimension_semantics<parallel>], iteration_bounds = array<i64: 1>, scalar_prefetch = 0 : i64, scratch_operands = 0 : i64, tpu.core_type = #tpu.core_type<tc>, window_params = [{transform_indices = @transform_0, window_bounds = array<i64: 2, 8, 256>}, {transform_indices = @transform_1, window_bounds = array<i64: 2, 8, 256>}, {transform_indices = @transform_2, window_bounds = array<i64: 2, 8, 256>}, {transform_indices = @transform_3, window_bounds = array<i64: 2, 1, 8>}, {pipeline_mode = #tpu.pipeline_mode<synchronous>, transform_indices = @transform_4, window_bounds = array<i64: 256, 256>}, {pipeline_mode = #tpu.pipeline_mode<synchronous>, transform_indices = @transform_5, window_bounds = array<i64: 1, 256>}, {pipeline_mode = #tpu.pipeline_mode<synchronous>, transform_indices = @transform_6, window_bounds = array<i64: 256, 256>}, {pipeline_mode = #tpu.pipeline_mode<synchronous>, transform_indices = @transform_7, window_bounds = array<i64: 1, 256>}, {pipeline_mode = #tpu.pipeline_mode<synchronous>, transform_indices = @transform_8, window_bounds = array<i64: 256, 256>}, {pipeline_mode = #tpu.pipeline_mode<synchronous>, transform_indices = @transform_9, window_bounds = array<i64: 1, 256>}, {pipeline_mode = #tpu.pipeline_mode<synchronous>, transform_indices = @transform_10, window_bounds = array<i64: 256, 256>}, {pipeline_mode = #tpu.pipeline_mode<synchronous>, transform_indices = @transform_11, window_bounds = array<i64: 1, 256>}, {transform_indices = @transform_12, window_bounds = array<i64: 2, 8, 256>}]} {
    %c0 = arith.constant 0 : index
    %c0_0 = arith.constant 0 : index
    %c0_1 = arith.constant 0 : index
    %0 = vector.load %arg1[%c0, %c0_0, %c0_1] : memref<2x8x256xf32, #tpu.memory_space<vmem>>, vector<2x8x256xf32>
    %1 = vector.shape_cast %0 : vector<2x8x256xf32> to vector<16x256xf32>
    %c0_2 = arith.constant 0 : index
    %c0_3 = arith.constant 0 : index
    %c0_4 = arith.constant 0 : index
    %2 = vector.load %arg2[%c0_2, %c0_3, %c0_4] : memref<2x8x256xf32, #tpu.memory_space<vmem>>, vector<2x8x256xf32>
    %3 = vector.shape_cast %2 : vector<2x8x256xf32> to vector<16x256xf32>
    %c0_5 = arith.constant 0 : index
    %c0_6 = arith.constant 0 : index
    %c0_7 = arith.constant 0 : index
    %4 = vector.load %arg3[%c0_5, %c0_6, %c0_7] : memref<2x8x256xf32, #tpu.memory_space<vmem>>, vector<2x8x256xf32>
    %5 = vector.shape_cast %4 : vector<2x8x256xf32> to vector<16x256xf32>
    %c0_8 = arith.constant 0 : index
    %c0_9 = arith.constant 0 : index
    %6 = vector.load %arg5[%c0_8, %c0_9] : memref<256x256xf32, #tpu.memory_space<vmem>>, vector<256x256xf32>
    %c0_10 = arith.constant 0 : index
    %c0_11 = arith.constant 0 : index
    %7 = vector.load %arg7[%c0_10, %c0_11] : memref<256x256xf32, #tpu.memory_space<vmem>>, vector<256x256xf32>
    %c0_12 = arith.constant 0 : index
    %c0_13 = arith.constant 0 : index
    %8 = vector.load %arg9[%c0_12, %c0_13] : memref<256x256xf32, #tpu.memory_space<vmem>>, vector<256x256xf32>
    %c0_14 = arith.constant 0 : index
    %c0_15 = arith.constant 0 : index
    %9 = vector.load %arg11[%c0_14, %c0_15] : memref<256x256xf32, #tpu.memory_space<vmem>>, vector<256x256xf32>
    %cst = arith.constant dense<0.000000e+00> : vector<16x256xf32>
    %10 = tpu.matmul %1, %6, %cst {dimension_numbers = #tpu.dot_dimension_numbers<[1], [0], [0], [1], [0, 0, 1, 1], [], []>} : vector<16x256xf32>, vector<256x256xf32>, vector<16x256xf32> -> vector<16x256xf32>
    %c0_16 = arith.constant 0 : index
    %c0_17 = arith.constant 0 : index
    %11 = vector.load %arg6[%c0_16, %c0_17] : memref<1x256xf32, #tpu.memory_space<vmem>>, vector<1x256xf32>
    %12 = vector.broadcast %11 : vector<1x256xf32> to vector<16x256xf32>
    %13 = arith.addf %10, %12 : vector<16x256xf32>
    %cst_18 = arith.constant dense<0.000000e+00> : vector<16x256xf32>
    %14 = tpu.matmul %3, %7, %cst_18 {dimension_numbers = #tpu.dot_dimension_numbers<[1], [0], [0], [1], [0, 0, 1, 1], [], []>} : vector<16x256xf32>, vector<256x256xf32>, vector<16x256xf32> -> vector<16x256xf32>
    %c0_19 = arith.constant 0 : index
    %c0_20 = arith.constant 0 : index
    %15 = vector.load %arg8[%c0_19, %c0_20] : memref<1x256xf32, #tpu.memory_space<vmem>>, vector<1x256xf32>
    %16 = vector.broadcast %15 : vector<1x256xf32> to vector<16x256xf32>
    %17 = arith.addf %14, %16 : vector<16x256xf32>
    %cst_21 = arith.constant dense<0.000000e+00> : vector<16x256xf32>
    %18 = tpu.matmul %5, %8, %cst_21 {dimension_numbers = #tpu.dot_dimension_numbers<[1], [0], [0], [1], [0, 0, 1, 1], [], []>} : vector<16x256xf32>, vector<256x256xf32>, vector<16x256xf32> -> vector<16x256xf32>
    %c0_22 = arith.constant 0 : index
    %c0_23 = arith.constant 0 : index
    %19 = vector.load %arg10[%c0_22, %c0_23] : memref<1x256xf32, #tpu.memory_space<vmem>>, vector<1x256xf32>
    %20 = vector.broadcast %19 : vector<1x256xf32> to vector<16x256xf32>
    %21 = arith.addf %18, %20 : vector<16x256xf32>
    %cst_24 = arith.constant 0.0883883461 : f32
    %22 = vector.broadcast %cst_24 : f32 to vector<16x256xf32>
    %23 = arith.mulf %13, %22 : vector<16x256xf32>
    %c0_25 = arith.constant 0 : index
    %c0_26 = arith.constant 0 : index
    %c0_27 = arith.constant 0 : index
    %24 = vector.load %arg4[%c0_25, %c0_26, %c0_27] : memref<2x1x8xf32, #tpu.memory_space<vmem>>, vector<1x1x8xf32>
    %25 = vector.shape_cast %24 : vector<1x1x8xf32> to vector<1x8xf32>
    %cst_28 = arith.constant 0.000000e+00 : f32
    %26 = vector.broadcast %cst_28 : f32 to vector<1x8xf32>
    %27 = arith.cmpf ogt, %25, %26 : vector<1x8xf32>
    %cst_29 = arith.constant 0.000000e+00 : f32
    %cst_30 = arith.constant -1.000000e+09 : f32
    %28 = vector.broadcast %cst_29 : f32 to vector<1x8xf32>
    %29 = vector.broadcast %cst_30 : f32 to vector<1x8xf32>
    %30 = arith.select %27, %28, %29 : vector<1x8xi1>, vector<1x8xf32>
    %31 = vector.extract_strided_slice %23 {offsets = [0, 0], sizes = [8, 128], strides = [1, 1]} : vector<16x256xf32> to vector<8x128xf32>
    %32 = vector.extract_strided_slice %17 {offsets = [0, 0], sizes = [8, 128], strides = [1, 1]} : vector<16x256xf32> to vector<8x128xf32>
    %33 = vector.extract_strided_slice %21 {offsets = [0, 0], sizes = [8, 128], strides = [1, 1]} : vector<16x256xf32> to vector<8x128xf32>
    %cst_31 = arith.constant dense<0.000000e+00> : vector<8x8xf32>
    %34 = tpu.matmul %31, %32, %cst_31 {dimension_numbers = #tpu.dot_dimension_numbers<[1], [1], [0], [0], [0, 0, 1, 0], [], []>} : vector<8x128xf32>, vector<8x128xf32>, vector<8x8xf32> -> vector<8x8xf32>
    %35 = vector.broadcast %30 : vector<1x8xf32> to vector<8x8xf32>
    %36 = arith.addf %34, %35 : vector<8x8xf32>
    %cst_32 = arith.constant dense<0xFF800000> : vector<8xf32>
    %37 = vector.multi_reduction <maximumf>, %36, %cst_32 [1] : vector<8x8xf32> to vector<8xf32>
    %38 = vector.shape_cast %37 : vector<8xf32> to vector<8x1xf32>
    %39 = vector.broadcast %38 : vector<8x1xf32> to vector<8x8xf32>
    %40 = arith.subf %36, %39 : vector<8x8xf32>
    %41 = math.exp %40 : vector<8x8xf32>
    %cst_33 = arith.constant dense<0.000000e+00> : vector<8xf32>
    %42 = vector.multi_reduction <add>, %41, %cst_33 [1] : vector<8x8xf32> to vector<8xf32>
    %43 = vector.shape_cast %42 : vector<8xf32> to vector<8x1xf32>
    %44 = vector.broadcast %43 : vector<8x1xf32> to vector<8x8xf32>
    %45 = arith.divf %41, %44 : vector<8x8xf32>
    %cst_34 = arith.constant dense<0.000000e+00> : vector<8x128xf32>
    %46 = tpu.matmul %45, %33, %cst_34 {dimension_numbers = #tpu.dot_dimension_numbers<[1], [0], [0], [1], [0, 0, 1, 1], [], []>} : vector<8x8xf32>, vector<8x128xf32>, vector<8x128xf32> -> vector<8x128xf32>
    %47 = vector.extract_strided_slice %23 {offsets = [0, 128], sizes = [8, 128], strides = [1, 1]} : vector<16x256xf32> to vector<8x128xf32>
    %48 = vector.extract_strided_slice %17 {offsets = [0, 128], sizes = [8, 128], strides = [1, 1]} : vector<16x256xf32> to vector<8x128xf32>
    %49 = vector.extract_strided_slice %21 {offsets = [0, 128], sizes = [8, 128], strides = [1, 1]} : vector<16x256xf32> to vector<8x128xf32>
    %cst_35 = arith.constant dense<0.000000e+00> : vector<8x8xf32>
    %50 = tpu.matmul %47, %48, %cst_35 {dimension_numbers = #tpu.dot_dimension_numbers<[1], [1], [0], [0], [0, 0, 1, 0], [], []>} : vector<8x128xf32>, vector<8x128xf32>, vector<8x8xf32> -> vector<8x8xf32>
    %51 = vector.broadcast %30 : vector<1x8xf32> to vector<8x8xf32>
    %52 = arith.addf %50, %51 : vector<8x8xf32>
    %cst_36 = arith.constant dense<0xFF800000> : vector<8xf32>
    %53 = vector.multi_reduction <maximumf>, %52, %cst_36 [1] : vector<8x8xf32> to vector<8xf32>
    %54 = vector.shape_cast %53 : vector<8xf32> to vector<8x1xf32>
    %55 = vector.broadcast %54 : vector<8x1xf32> to vector<8x8xf32>
    %56 = arith.subf %52, %55 : vector<8x8xf32>
    %57 = math.exp %56 : vector<8x8xf32>
    %cst_37 = arith.constant dense<0.000000e+00> : vector<8xf32>
    %58 = vector.multi_reduction <add>, %57, %cst_37 [1] : vector<8x8xf32> to vector<8xf32>
    %59 = vector.shape_cast %58 : vector<8xf32> to vector<8x1xf32>
    %60 = vector.broadcast %59 : vector<8x1xf32> to vector<8x8xf32>
    %61 = arith.divf %57, %60 : vector<8x8xf32>
    %cst_38 = arith.constant dense<0.000000e+00> : vector<8x128xf32>
    %62 = tpu.matmul %61, %49, %cst_38 {dimension_numbers = #tpu.dot_dimension_numbers<[1], [0], [0], [1], [0, 0, 1, 1], [], []>} : vector<8x8xf32>, vector<8x128xf32>, vector<8x128xf32> -> vector<8x128xf32>
    %63 = tpu.concatenate %46, %62 in 1 : vector<8x128xf32>, vector<8x128xf32> -> vector<8x256xf32>
    %cst_39 = arith.constant dense<0.000000e+00> : vector<8x256xf32>
    %64 = tpu.matmul %63, %9, %cst_39 {dimension_numbers = #tpu.dot_dimension_numbers<[1], [0], [0], [1], [0, 0, 1, 1], [], []>} : vector<8x256xf32>, vector<256x256xf32>, vector<8x256xf32> -> vector<8x256xf32>
    %c0_40 = arith.constant 0 : index
    %c0_41 = arith.constant 0 : index
    %65 = vector.load %arg12[%c0_40, %c0_41] : memref<1x256xf32, #tpu.memory_space<vmem>>, vector<1x256xf32>
    %66 = vector.broadcast %65 : vector<1x256xf32> to vector<8x256xf32>
    %67 = arith.addf %64, %66 : vector<8x256xf32>
    %c0_42 = arith.constant 0 : index
    %c0_43 = arith.constant 0 : index
    %c0_44 = arith.constant 0 : index
    %68 = vector.load %arg13[%c0_42, %c0_43, %c0_44] : memref<2x8x256xf32, #tpu.memory_space<vmem>>, vector<1x8x256xf32>
    %69 = vector.shape_cast %68 : vector<1x8x256xf32> to vector<8x256xf32>
    %70 = vector.shape_cast %67 : vector<8x256xf32> to vector<1x8x256xf32>
    tpu.vector_store %arg13[%c0_42, %c0_43, %c0_44], %70 {strides = array<i32>} : memref<2x8x256xf32, #tpu.memory_space<vmem>>, vector<1x8x256xf32>,
    %c1 = arith.constant 1 : index
    %c0_45 = arith.constant 0 : index
    %c0_46 = arith.constant 0 : index
    %71 = vector.load %arg4[%c1, %c0_45, %c0_46] : memref<2x1x8xf32, #tpu.memory_space<vmem>>, vector<1x1x8xf32>
    %72 = vector.shape_cast %71 : vector<1x1x8xf32> to vector<1x8xf32>
    %cst_47 = arith.constant 0.000000e+00 : f32
    %73 = vector.broadcast %cst_47 : f32 to vector<1x8xf32>
    %74 = arith.cmpf ogt, %72, %73 : vector<1x8xf32>
    %cst_48 = arith.constant 0.000000e+00 : f32
    %cst_49 = arith.constant -1.000000e+09 : f32
    %75 = vector.broadcast %cst_48 : f32 to vector<1x8xf32>
    %76 = vector.broadcast %cst_49 : f32 to vector<1x8xf32>
    %77 = arith.select %74, %75, %76 : vector<1x8xi1>, vector<1x8xf32>
    %78 = vector.extract_strided_slice %23 {offsets = [8, 0], sizes = [8, 128], strides = [1, 1]} : vector<16x256xf32> to vector<8x128xf32>
    %79 = vector.extract_strided_slice %17 {offsets = [8, 0], sizes = [8, 128], strides = [1, 1]} : vector<16x256xf32> to vector<8x128xf32>
    %80 = vector.extract_strided_slice %21 {offsets = [8, 0], sizes = [8, 128], strides = [1, 1]} : vector<16x256xf32> to vector<8x128xf32>
    %cst_50 = arith.constant dense<0.000000e+00> : vector<8x8xf32>
    %81 = tpu.matmul %78, %79, %cst_50 {dimension_numbers = #tpu.dot_dimension_numbers<[1], [1], [0], [0], [0, 0, 1, 0], [], []>} : vector<8x128xf32>, vector<8x128xf32>, vector<8x8xf32> -> vector<8x8xf32>
    %82 = vector.broadcast %77 : vector<1x8xf32> to vector<8x8xf32>
    %83 = arith.addf %81, %82 : vector<8x8xf32>
    %cst_51 = arith.constant dense<0xFF800000> : vector<8xf32>
    %84 = vector.multi_reduction <maximumf>, %83, %cst_51 [1] : vector<8x8xf32> to vector<8xf32>
    %85 = vector.shape_cast %84 : vector<8xf32> to vector<8x1xf32>
    %86 = vector.broadcast %85 : vector<8x1xf32> to vector<8x8xf32>
    %87 = arith.subf %83, %86 : vector<8x8xf32>
    %88 = math.exp %87 : vector<8x8xf32>
    %cst_52 = arith.constant dense<0.000000e+00> : vector<8xf32>
    %89 = vector.multi_reduction <add>, %88, %cst_52 [1] : vector<8x8xf32> to vector<8xf32>
    %90 = vector.shape_cast %89 : vector<8xf32> to vector<8x1xf32>
    %91 = vector.broadcast %90 : vector<8x1xf32> to vector<8x8xf32>
    %92 = arith.divf %88, %91 : vector<8x8xf32>
    %cst_53 = arith.constant dense<0.000000e+00> : vector<8x128xf32>
    %93 = tpu.matmul %92, %80, %cst_53 {dimension_numbers = #tpu.dot_dimension_numbers<[1], [0], [0], [1], [0, 0, 1, 1], [], []>} : vector<8x8xf32>, vector<8x128xf32>, vector<8x128xf32> -> vector<8x128xf32>
    %94 = vector.extract_strided_slice %23 {offsets = [8, 128], sizes = [8, 128], strides = [1, 1]} : vector<16x256xf32> to vector<8x128xf32>
    %95 = vector.extract_strided_slice %17 {offsets = [8, 128], sizes = [8, 128], strides = [1, 1]} : vector<16x256xf32> to vector<8x128xf32>
    %96 = vector.extract_strided_slice %21 {offsets = [8, 128], sizes = [8, 128], strides = [1, 1]} : vector<16x256xf32> to vector<8x128xf32>
    %cst_54 = arith.constant dense<0.000000e+00> : vector<8x8xf32>
    %97 = tpu.matmul %94, %95, %cst_54 {dimension_numbers = #tpu.dot_dimension_numbers<[1], [1], [0], [0], [0, 0, 1, 0], [], []>} : vector<8x128xf32>, vector<8x128xf32>, vector<8x8xf32> -> vector<8x8xf32>
    %98 = vector.broadcast %77 : vector<1x8xf32> to vector<8x8xf32>
    %99 = arith.addf %97, %98 : vector<8x8xf32>
    %cst_55 = arith.constant dense<0xFF800000> : vector<8xf32>
    %100 = vector.multi_reduction <maximumf>, %99, %cst_55 [1] : vector<8x8xf32> to vector<8xf32>
    %101 = vector.shape_cast %100 : vector<8xf32> to vector<8x1xf32>
    %102 = vector.broadcast %101 : vector<8x1xf32> to vector<8x8xf32>
    %103 = arith.subf %99, %102 : vector<8x8xf32>
    %104 = math.exp %103 : vector<8x8xf32>
    %cst_56 = arith.constant dense<0.000000e+00> : vector<8xf32>
    %105 = vector.multi_reduction <add>, %104, %cst_56 [1] : vector<8x8xf32> to vector<8xf32>
    %106 = vector.shape_cast %105 : vector<8xf32> to vector<8x1xf32>
    %107 = vector.broadcast %106 : vector<8x1xf32> to vector<8x8xf32>
    %108 = arith.divf %104, %107 : vector<8x8xf32>
    %cst_57 = arith.constant dense<0.000000e+00> : vector<8x128xf32>
    %109 = tpu.matmul %108, %96, %cst_57 {dimension_numbers = #tpu.dot_dimension_numbers<[1], [0], [0], [1], [0, 0, 1, 1], [], []>} : vector<8x8xf32>, vector<8x128xf32>, vector<8x128xf32> -> vector<8x128xf32>
    %110 = tpu.concatenate %93, %109 in 1 : vector<8x128xf32>, vector<8x128xf32> -> vector<8x256xf32>
    %cst_58 = arith.constant dense<0.000000e+00> : vector<8x256xf32>
    %111 = tpu.matmul %110, %9, %cst_58 {dimension_numbers = #tpu.dot_dimension_numbers<[1], [0], [0], [1], [0, 0, 1, 1], [], []>} : vector<8x256xf32>, vector<256x256xf32>, vector<8x256xf32> -> vector<8x256xf32>
    %c0_59 = arith.constant 0 : index
    %c0_60 = arith.constant 0 : index
    %112 = vector.load %arg12[%c0_59, %c0_60] : memref<1x256xf32, #tpu.memory_space<vmem>>, vector<1x256xf32>
    %113 = vector.broadcast %112 : vector<1x256xf32> to vector<8x256xf32>
    %114 = arith.addf %111, %113 : vector<8x256xf32>
    %c1_61 = arith.constant 1 : index
    %c0_62 = arith.constant 0 : index
    %c0_63 = arith.constant 0 : index
    %115 = vector.load %arg13[%c1_61, %c0_62, %c0_63] : memref<2x8x256xf32, #tpu.memory_space<vmem>>, vector<1x8x256xf32>
    %116 = vector.shape_cast %115 : vector<1x8x256xf32> to vector<8x256xf32>
    %117 = vector.shape_cast %114 : vector<8x256xf32> to vector<1x8x256xf32>
    tpu.vector_store %arg13[%c1_61, %c0_62, %c0_63], %117 {strides = array<i32>} : memref<2x8x256xf32, #tpu.memory_space<vmem>>, vector<1x8x256xf32>,
    return
  }
  func.func @transform_0(%arg0: i32) -> (i32, i32, i32) {
    %c0_i32 = arith.constant 0 : i32
    %c0_i32_0 = arith.constant 0 : i32
    %c0_i32_1 = arith.constant 0 : i32
    return %arg0, %c0_i32, %c0_i32_0 : i32, i32, i32
  }
  func.func @transform_1(%arg0: i32) -> (i32, i32, i32) {
    %c0_i32 = arith.constant 0 : i32
    %c0_i32_0 = arith.constant 0 : i32
    %c0_i32_1 = arith.constant 0 : i32
    return %arg0, %c0_i32, %c0_i32_0 : i32, i32, i32
  }
  func.func @transform_2(%arg0: i32) -> (i32, i32, i32) {
    %c0_i32 = arith.constant 0 : i32
    %c0_i32_0 = arith.constant 0 : i32
    %c0_i32_1 = arith.constant 0 : i32
    return %arg0, %c0_i32, %c0_i32_0 : i32, i32, i32
  }
  func.func @transform_3(%arg0: i32) -> (i32, i32, i32) {
    %c0_i32 = arith.constant 0 : i32
    %c0_i32_0 = arith.constant 0 : i32
    %c0_i32_1 = arith.constant 0 : i32
    return %arg0, %c0_i32, %c0_i32_0 : i32, i32, i32
  }
  func.func @transform_4(%arg0: i32) -> (i32, i32) {
    %c0_i32 = arith.constant 0 : i32
    %c0_i32_0 = arith.constant 0 : i32
    %c0_i32_1 = arith.constant 0 : i32
    return %c0_i32, %c0_i32_0 : i32, i32
  }
  func.func @transform_5(%arg0: i32) -> (i32, i32) {
    %c0_i32 = arith.constant 0 : i32
    %c0_i32_0 = arith.constant 0 : i32
    %c0_i32_1 = arith.constant 0 : i32
    return %c0_i32, %c0_i32_0 : i32, i32
  }
  func.func @transform_6(%arg0: i32) -> (i32, i32) {
    %c0_i32 = arith.constant 0 : i32
    %c0_i32_0 = arith.constant 0 : i32
    %c0_i32_1 = arith.constant 0 : i32
    return %c0_i32, %c0_i32_0 : i32, i32
  }
  func.func @transform_7(%arg0: i32) -> (i32, i32) {
    %c0_i32 = arith.constant 0 : i32
    %c0_i32_0 = arith.constant 0 : i32
    %c0_i32_1 = arith.constant 0 : i32
    return %c0_i32, %c0_i32_0 : i32, i32
  }
  func.func @transform_8(%arg0: i32) -> (i32, i32) {
    %c0_i32 = arith.constant 0 : i32
    %c0_i32_0 = arith.constant 0 : i32
    %c0_i32_1 = arith.constant 0 : i32
    return %c0_i32, %c0_i32_0 : i32, i32
  }
  func.func @transform_9(%arg0: i32) -> (i32, i32) {
    %c0_i32 = arith.constant 0 : i32
    %c0_i32_0 = arith.constant 0 : i32
    %c0_i32_1 = arith.constant 0 : i32
    return %c0_i32, %c0_i32_0 : i32, i32
  }
  func.func @transform_10(%arg0: i32) -> (i32, i32) {
    %c0_i32 = arith.constant 0 : i32
    %c0_i32_0 = arith.constant 0 : i32
    %c0_i32_1 = arith.constant 0 : i32
    return %c0_i32, %c0_i32_0 : i32, i32
  }
  func.func @transform_11(%arg0: i32) -> (i32, i32) {
    %c0_i32 = arith.constant 0 : i32
    %c0_i32_0 = arith.constant 0 : i32
    %c0_i32_1 = arith.constant 0 : i32
    return %c0_i32, %c0_i32_0 : i32, i32
  }
  func.func @transform_12(%arg0: i32) -> (i32, i32, i32) {
    %c0_i32 = arith.constant 0 : i32
    %c0_i32_0 = arith.constant 0 : i32
    %c0_i32_1 = arith.constant 0 : i32
    return %arg0, %c0_i32, %c0_i32_0 : i32, i32, i32
  }
}

</mosaic_0001>

<bundles_post_ra>
// kernel: tpu_custom_call.1
= control target key start
LH: loop header
LB: loop body
LE: loop exit
PB: predicated region body
PF: predicated region fallthrough
CT: control target
= control target key end

     0   :  { %17 = vsyncpa [#allocation3], 0  ;;  %s2665_s0 = inlined_call_operand.hbm [shape: f32[2,8,256], index: 0, kind: input, shape index: {}]   ;;  %s2666_s1 = inlined_call_operand.hbm [shape: f32[2,8,256], index: 1, kind: input, shape index: {}]   ;;  %s2667_s2 = inlined_call_operand.hbm [shape: f32[2,8,256], index: 2, kind: input, shape index: {}]   ;;  %s2668_s3 = inlined_call_operand.hbm [shape: f32[2,1,8], index: 3, kind: input, shape index: {}]   ;;  %s2669_s4 = inlined_call_operand.hbm [shape: f32[256,256], index: 4, kind: input, shape index: {}]   ;;  %s2670_s5 = inlined_call_operand.hbm [shape: f32[1,256], index: 5, kind: input, shape index: {}]   ;;  %s2671_s6 = inlined_call_operand.hbm [shape: f32[256,256], index: 6, kind: input, shape index: {}]   ;;  %s2672_s7 = inlined_call_operand.hbm [shape: f32[1,256], index: 7, kind: input, shape index: {}]   ;;  %s2673_s8 = inlined_call_operand.hbm [shape: f32[256,256], index: 8, kind: input, shape index: {}]   ;;  %s2674_s9 = inlined_call_operand.hbm [shape: f32[1,256], index: 9, kind: input, shape index: {}]   ;;  %s2675_s10 = inlined_call_operand.hbm [shape: f32[256,256], index: 10, kind: input, shape index: {}]   ;;  %s2676_s11 = inlined_call_operand.hbm [shape: f32[1,256], index: 11, kind: input, shape index: {}]   ;;  %s2677_s12 = inlined_call_operand.hbm [shape: f32[2,8,256], index: 12, kind: output, shape index: {}]  }
   0x1   :  { %18 = vsyncpa [#allocation6], 0 }
   0x2   :  { %19 = vsyncpa [#allocation9], 0 }
   0x3   :  { %20 = vsyncpa [#allocation12], 0 }
   0x4   :  { %21 = vsyncpa [#allocation15], 0 }
   0x5   :  { %22 = vsyncpa [#allocation18], 0 }
   0x6   :  { %23 = vsyncpa [#allocation21], 0 }
   0x7   :  { %24 = vsyncpa [#allocation4], 0  ;;  %s2315_s21 = smov [#allocation5]   ;;  %s2316_s23 = smov [#allocation8]  }
   0x8   :  { %s42_s22 = sshll.u32 %s2315_s21, 4  ;;  %s66_s24 = sshll.u32 %s2316_s23, 4  ;;  %s43_s22 = int_to_ptr.vmem [resolvable:$true] %s42_s22  ;;  %s2399_s24 = int_to_ptr.vmem [resolvable:$true] %s66_s24 }
   0x9   :  { %s2013_s27 = scalar_lea.hbm %s2666_s1, 512 }
   0xa   :  { %p2014_p0 = scmp.ne.s32.totalorder %s2666_s1, %s2013_s27  ;;  %p2017_p1 = scmp.lt.u32.totalorder %s2013_s27, %s2666_s1 }
   0xc   :  { %p2019_p2 = pnand %p2017_p1, %p2014_p0 }
   0xe   :  { %2022 = shalt.err (!%p2019_p2)
}
   0xf   :  { %s2023_s14 = scalar_lea.vmem %s43_s22, 512  ;;  %p2028_p4 = scmp.lt.s32.totalorder %s43_s22, %s43_s22 }
  0x10   :  { %p2024_p3 = scmp.ne.s32.totalorder %s43_s22, %s2023_s14  ;;  %p2029_p5 = scmp.lt.s32.totalorder %s2023_s14, %s2023_s14 }
  0x12   :  { %p2030_p6 = por %p2029_p5, %p2028_p4 }
  0x14   :  { %p2031_p7 = pnand %p2030_p6, %p2024_p3 }
  0x16   :  { %2034 = shalt.err (!%p2031_p7)
}
  0x17   :  { %s2317_s15 = smov 256   ;;  %s2318_s16 = smov 16  }
  0x18   :  { %48 = dma.hbm_to_vmem [thread:$0]  %s2666_s1, 512, %s43_s22, [#allocation6], %s2317_s15, %s2317_s15, %s2318_s16  }
  0x19   :  { %s2035_s21 = scalar_lea.hbm %s2668_s3, 32 }
  0x1a   :  { %p2036_p8 = scmp.ne.s32.totalorder %s2668_s3, %s2035_s21  ;;  %p2039_p9 = scmp.lt.u32.totalorder %s2035_s21, %s2668_s3 }
  0x1c   :  { %p2041_p10 = pnand %p2039_p9, %p2036_p8 }
  0x1e   :  { %2044 = shalt.err (!%p2041_p10)
}
  0x1f   :  { %s2045_s28 = scalar_lea.vmem %s2399_s24, 32  ;;  %p2050_p12 = scmp.lt.s32.totalorder %s2399_s24, %s2399_s24 }
  0x20   :  { %p2046_p11 = scmp.ne.s32.totalorder %s2399_s24, %s2045_s28  ;;  %p2051_p13 = scmp.lt.s32.totalorder %s2045_s28, %s2045_s28 }
  0x22   :  { %p2052_p0 = por %p2051_p13, %p2050_p12 }
  0x24   :  { %p2053_p1 = pnand %p2052_p0, %p2046_p11 }
  0x26   :  { %2056 = shalt.err (!%p2053_p1)
}
  0x27   :  { %s2319_s1 = smov 1   ;;  %s2320_s30 = smov [#allocation11]  }
  0x28   :  { %72 = dma.hbm_to_vmem [thread:$0]  %s2668_s3, 32, %s2399_s24, [#allocation9], %s2318_s16, %s2318_s16, %s2319_s1  }
  0x29   :  { %s91_s13 = sshll.u32 %s2320_s30, 4  ;;  %s2321_s14 = smov [#allocation14]   ;;  %s92_s13 = int_to_ptr.vmem [resolvable:$true] %s91_s13 }
  0x2a   :  { %s113_s17 = sshll.u32 %s2321_s14, 4  ;;  %s2057_s20 = scalar_lea.hbm %s2670_s5, 32  ;;  %s114_s17 = int_to_ptr.vmem [resolvable:$true] %s113_s17 }
  0x2b   :  { %p2058_p2 = scmp.ne.s32.totalorder %s2670_s5, %s2057_s20  ;;  %p2061_p3 = scmp.lt.u32.totalorder %s2057_s20, %s2670_s5 }
  0x2d   :  { %p2063_p4 = pnand %p2061_p3, %p2058_p2 }
  0x2f   :  { %2066 = shalt.err (!%p2063_p4)
}
  0x30   :  { %s2067_s3 = scalar_lea.vmem %s92_s13, 32  ;;  %p2072_p6 = scmp.lt.s32.totalorder %s92_s13, %s92_s13 }
  0x31   :  { %p2068_p5 = scmp.ne.s32.totalorder %s92_s13, %s2067_s3  ;;  %p2073_p7 = scmp.lt.s32.totalorder %s2067_s3, %s2067_s3 }
  0x33   :  { %p2074_p8 = por %p2073_p7, %p2072_p6 }
  0x35   :  { %p2075_p9 = pnand %p2074_p8, %p2068_p5 }
  0x37   :  { %2078 = shalt.err (!%p2075_p9)
}
  0x38   :  { %94 = dma.hbm_to_vmem [thread:$0]  %s2670_s5, 32, %s92_s13, [#allocation12]  }
  0x39   :  { %s2079_s22 = scalar_lea.hbm %s2672_s7, 32 }
  0x3a   :  { %p2080_p10 = scmp.ne.s32.totalorder %s2672_s7, %s2079_s22  ;;  %p2083_p11 = scmp.lt.u32.totalorder %s2079_s22, %s2672_s7 }
  0x3c   :  { %p2085_p12 = pnand %p2083_p11, %p2080_p10 }
  0x3e   :  { %2088 = shalt.err (!%p2085_p12)
}
  0x3f   :  { %s2089_s19 = scalar_lea.vmem %s114_s17, 32  ;;  %p2094_p0 = scmp.lt.s32.totalorder %s114_s17, %s114_s17 }
  0x40   :  { %p2090_p13 = scmp.ne.s32.totalorder %s114_s17, %s2089_s19  ;;  %p2095_p1 = scmp.lt.s32.totalorder %s2089_s19, %s2089_s19 }
  0x42   :  { %p2096_p2 = por %p2095_p1, %p2094_p0 }
  0x44   :  { %p2097_p3 = pnand %p2096_p2, %p2090_p13 }
  0x46   :  { %2100 = shalt.err (!%p2097_p3)
}
  0x47   :  { %116 = dma.hbm_to_vmem [thread:$0]  %s2672_s7, 32, %s114_s17, [#allocation15]  }
  0x48   :  { %s2322_s20 = smov [#allocation17]   ;;  %s2323_s23 = smov [#allocation2]  }
  0x49   :  { %s135_s21 = sshll.u32 %s2322_s20, 4  ;;  %s30_s25 = sshll.u32 %s2323_s23, 4  ;;  %s136_s21 = int_to_ptr.vmem [resolvable:$true] %s135_s21  ;;  %s31_s25 = int_to_ptr.vmem [resolvable:$true] %s30_s25 }
  0x4a   :  { %s2101_s24 = scalar_lea.hbm %s2674_s9, 32 }
  0x4b   :  { %p2102_p4 = scmp.ne.s32.totalorder %s2674_s9, %s2101_s24  ;;  %p2105_p5 = scmp.lt.u32.totalorder %s2101_s24, %s2674_s9 }
  0x4d   :  { %p2107_p6 = pnand %p2105_p5, %p2102_p4 }
  0x4f   :  { %2110 = shalt.err (!%p2107_p6)
}
  0x50   :  { %s2111_s7 = scalar_lea.vmem %s136_s21, 32  ;;  %p2116_p8 = scmp.lt.s32.totalorder %s136_s21, %s136_s21 }
  0x51   :  { %p2112_p7 = scmp.ne.s32.totalorder %s136_s21, %s2111_s7  ;;  %p2117_p9 = scmp.lt.s32.totalorder %s2111_s7, %s2111_s7 }
  0x53   :  { %p2118_p10 = por %p2117_p9, %p2116_p8 }
  0x55   :  { %p2119_p11 = pnand %p2118_p10, %p2112_p7 }
  0x57   :  { %2122 = shalt.err (!%p2119_p11)
}
  0x58   :  { %138 = dma.hbm_to_vmem [thread:$0]  %s2674_s9, 32, %s136_s21, [#allocation18]  }
  0x59   :  { %s2123_s18 = scalar_lea.hbm %s2665_s0, 512 }
  0x5a   :  { %p2124_p12 = scmp.ne.s32.totalorder %s2665_s0, %s2123_s18  ;;  %p2127_p13 = scmp.lt.u32.totalorder %s2123_s18, %s2665_s0 }
  0x5c   :  { %p2129_p0 = pnand %p2127_p13, %p2124_p12 }
  0x5e   :  { %2132 = shalt.err (!%p2129_p0)
}
  0x5f   :  { %s2133_s23 = scalar_lea.vmem %s31_s25, 512  ;;  %p2138_p2 = scmp.lt.s32.totalorder %s31_s25, %s31_s25 }
  0x60   :  { %p2134_p1 = scmp.ne.s32.totalorder %s31_s25, %s2133_s23  ;;  %p2139_p3 = scmp.lt.s32.totalorder %s2133_s23, %s2133_s23 }
  0x62   :  { %p2140_p4 = por %p2139_p3, %p2138_p2 }
  0x64   :  { %p2141_p5 = pnand %p2140_p4, %p2134_p1 }
  0x66   :  { %2144 = shalt.err (!%p2141_p5)
}
  0x67   :  { %36 = dma.hbm_to_vmem [thread:$0]  %s2665_s0, 512, %s31_s25, [#allocation3], %s2317_s15, %s2317_s15, %s2318_s16  }
  0x68   :  { %s2324_s26 = smov [#allocation7]   ;;  %s2325_s24 = smov [#allocation10]  }
  0x69   :  { %s54_s3 = sshll.u32 %s2324_s26, 4  ;;  %s78_s27 = sshll.u32 %s2325_s24, 4  ;;  %s55_s3 = int_to_ptr.vmem [resolvable:$true] %s54_s3  ;;  %s79_s27 = int_to_ptr.vmem [resolvable:$true] %s78_s27 }
  0x6a   :  { %s2145_s22 = scalar_lea.hbm %s2667_s2, 512 }
  0x6b   :  { %p2146_p6 = scmp.ne.s32.totalorder %s2667_s2, %s2145_s22  ;;  %p2149_p7 = scmp.lt.u32.totalorder %s2145_s22, %s2667_s2 }
  0x6d   :  { %p2151_p8 = pnand %p2149_p7, %p2146_p6 }
  0x6f   :  { %2154 = shalt.err (!%p2151_p8)
}
  0x70   :  { %s2155_s0 = scalar_lea.vmem %s55_s3, 512  ;;  %p2160_p10 = scmp.lt.s32.totalorder %s55_s3, %s55_s3 }
  0x71   :  { %p2156_p9 = scmp.ne.s32.totalorder %s55_s3, %s2155_s0  ;;  %p2161_p11 = scmp.lt.s32.totalorder %s2155_s0, %s2155_s0 }
  0x73   :  { %p2162_p12 = por %p2161_p11, %p2160_p10 }
  0x75   :  { %p2163_p13 = pnand %p2162_p12, %p2156_p9 }
  0x77   :  { %2166 = shalt.err (!%p2163_p13)
}
  0x78   :  { %60 = dma.hbm_to_vmem [thread:$0]  %s2667_s2, 512, %s55_s3, [#allocation6], %s2317_s15, %s2317_s15, %s2318_s16  }
  0x79   :  { %s2167_s5 = scalar_lea.hbm %s2669_s4, 8192 }
  0x7a   :  { %p2168_p0 = scmp.ne.s32.totalorder %s2669_s4, %s2167_s5  ;;  %p2171_p1 = scmp.lt.u32.totalorder %s2167_s5, %s2669_s4 }
  0x7c   :  { %p2173_p2 = pnand %p2171_p1, %p2168_p0 }
  0x7e   :  { %2176 = shalt.err (!%p2173_p2)
}
  0x7f   :  { %s2177_s21 = scalar_lea.vmem %s79_s27, 8192  ;;  %p2182_p4 = scmp.lt.s32.totalorder %s79_s27, %s79_s27 }
  0x80   :  { %p2178_p3 = scmp.ne.s32.totalorder %s79_s27, %s2177_s21  ;;  %p2183_p5 = scmp.lt.s32.totalorder %s2177_s21, %s2177_s21 }
  0x82   :  { %p2184_p6 = por %p2183_p5, %p2182_p4 }
  0x84   :  { %p2185_p7 = pnand %p2184_p6, %p2178_p3 }
  0x86   :  { %2188 = shalt.err (!%p2185_p7)
}
  0x87   :  { %84 = dma.hbm_to_vmem [thread:$0]  %s2669_s4, 8192, %s79_s27, [#allocation9], %s2317_s15, %s2317_s15, %s2318_s16  }
  0x88   :  { %s2326_s3 = smov [#allocation13]   ;;  %s2327_s28 = smov [#allocation16]  }
  0x89   :  { %s100_s24 = sshll.u32 %s2326_s3, 4  ;;  %s122_s1 = sshll.u32 %s2327_s28, 4  ;;  %s101_s24 = int_to_ptr.vmem [resolvable:$true] %s100_s24  ;;  %s123_s1 = int_to_ptr.vmem [resolvable:$true] %s122_s1 }
  0x8a   :  { %s2189_s17 = scalar_lea.hbm %s2671_s6, 8192 }
  0x8b   :  { %p2190_p8 = scmp.ne.s32.totalorder %s2671_s6, %s2189_s17  ;;  %p2193_p9 = scmp.lt.u32.totalorder %s2189_s17, %s2671_s6 }
  0x8d   :  { %p2195_p10 = pnand %p2193_p9, %p2190_p8 }
  0x8f   :  { %2198 = shalt.err (!%p2195_p10)
}
  0x90   :  { %s2199_s4 = scalar_lea.vmem %s101_s24, 8192  ;;  %p2204_p12 = scmp.lt.s32.totalorder %s101_s24, %s101_s24 }
  0x91   :  { %p2200_p11 = scmp.ne.s32.totalorder %s101_s24, %s2199_s4  ;;  %p2205_p13 = scmp.lt.s32.totalorder %s2199_s4, %s2199_s4 }
  0x93   :  { %p2206_p0 = por %p2205_p13, %p2204_p12 }
  0x95   :  { %p2207_p1 = pnand %p2206_p0, %p2200_p11 }
  0x97   :  { %2210 = shalt.err (!%p2207_p1)
}
  0x98   :  { %106 = dma.hbm_to_vmem [thread:$0]  %s2671_s6, 8192, %s101_s24, [#allocation12], %s2317_s15, %s2317_s15, %s2318_s16  }
  0x99   :  { %s2211_s5 = scalar_lea.hbm %s2673_s8, 8192 }
  0x9a   :  { %p2212_p2 = scmp.ne.s32.totalorder %s2673_s8, %s2211_s5  ;;  %p2215_p3 = scmp.lt.u32.totalorder %s2211_s5, %s2673_s8 }
  0x9c   :  { %p2217_p4 = pnand %p2215_p3, %p2212_p2 }
  0x9e   :  { %2220 = shalt.err (!%p2217_p4)
}
  0x9f   :  { %s2221_s21 = scalar_lea.vmem %s123_s1, 8192  ;;  %p2226_p6 = scmp.lt.s32.totalorder %s123_s1, %s123_s1 }
  0xa0   :  { %p2222_p5 = scmp.ne.s32.totalorder %s123_s1, %s2221_s21  ;;  %p2227_p7 = scmp.lt.s32.totalorder %s2221_s21, %s2221_s21 }
  0xa2   :  { %p2228_p8 = por %p2227_p7, %p2226_p6 }
  0xa4   :  { %p2229_p9 = pnand %p2228_p8, %p2222_p5 }
  0xa6   :  { %2232 = shalt.err (!%p2229_p9)
}
  0xa7   :  { %128 = dma.hbm_to_vmem [thread:$0]  %s2673_s8, 8192, %s123_s1, [#allocation15], %s2317_s15, %s2317_s15, %s2318_s16  }
  0xa8   :  { %s2328_s26 = smov [#allocation19]   ;;  %s2329_s24 = smov [#allocation20]  }
  0xa9   :  { %s144_s3 = sshll.u32 %s2328_s26, 4  ;;  %s157_s28 = sshll.u32 %s2329_s24, 4  ;;  %s145_s3 = int_to_ptr.vmem [resolvable:$true] %s144_s3  ;;  %s158_s28 = int_to_ptr.vmem [resolvable:$true] %s157_s28 }
  0xaa   :  { %s2233_s17 = scalar_lea.hbm %s2675_s10, 8192 }
  0xab   :  { %p2234_p10 = scmp.ne.s32.totalorder %s2675_s10, %s2233_s17  ;;  %p2237_p11 = scmp.lt.u32.totalorder %s2233_s17, %s2675_s10 }
  0xad   :  { %p2239_p12 = pnand %p2237_p11, %p2234_p10 }
  0xaf   :  { %2242 = shalt.err (!%p2239_p12)
}
  0xb0   :  { %s2243_s8 = scalar_lea.vmem %s145_s3, 8192  ;;  %p2248_p0 = scmp.lt.s32.totalorder %s145_s3, %s145_s3 }
  0xb1   :  { %p2244_p13 = scmp.ne.s32.totalorder %s145_s3, %s2243_s8  ;;  %p2249_p1 = scmp.lt.s32.totalorder %s2243_s8, %s2243_s8 }
  0xb3   :  { %p2250_p2 = por %p2249_p1, %p2248_p0 }
  0xb5   :  { %p2251_p3 = pnand %p2250_p2, %p2244_p13 }
  0xb7   :  { %2254 = shalt.err (!%p2251_p3)
}
  0xb8   :  { %150 = dma.hbm_to_vmem [thread:$0]  %s2675_s10, 8192, %s145_s3, [#allocation18], %s2317_s15, %s2317_s15, %s2318_s16  }
  0xb9   :  { %s2255_s18 = scalar_lea.hbm %s2676_s11, 32 }
  0xba   :  { %p2256_p4 = scmp.ne.s32.totalorder %s2676_s11, %s2255_s18  ;;  %p2259_p5 = scmp.lt.u32.totalorder %s2255_s18, %s2676_s11 }
  0xbc   :  { %p2261_p6 = pnand %p2259_p5, %p2256_p4 }
  0xbe   :  { %2264 = shalt.err (!%p2261_p6)
}
  0xbf   :  { %s2265_s23 = scalar_lea.vmem %s158_s28, 32  ;;  %p2270_p8 = scmp.lt.s32.totalorder %s158_s28, %s158_s28 }
  0xc0   :  { %p2266_p7 = scmp.ne.s32.totalorder %s158_s28, %s2265_s23  ;;  %p2271_p9 = scmp.lt.s32.totalorder %s2265_s23, %s2265_s23 }
  0xc2   :  { %p2272_p10 = por %p2271_p9, %p2270_p8 }
  0xc4   :  { %p2273_p11 = pnand %p2272_p10, %p2266_p7 }
  0xc6   :  { %2276 = shalt.err (!%p2273_p11)
}
  0xc7   :  { %160 = dma.hbm_to_vmem [thread:$0]  %s2676_s11, 32, %s158_s28, [#allocation21]  }
  0xc8   :  { %2299 = dma.done.wait [#allocation3], 512  }
  0xc9   :  { %2300 = vsyncadd [#allocation3], 4294966784 }
  0xca   :  { %2301 = dma.done.wait [#allocation6], 1024  }
  0xcb   :  { %2302 = vsyncadd [#allocation6], 4294966272 }
  0xcc   :  { %2303 = dma.done.wait [#allocation9], 8224  }
  0xcd   :  { %2304 = vsyncadd [#allocation9], 4294959072 }
  0xce   :  { %2305 = dma.done.wait [#allocation12], 8224  }
  0xcf   :  { %2306 = vsyncadd [#allocation12], 4294959072 }
  0xd0   :  { %2307 = dma.done.wait [#allocation15], 8224  }
  0xd1   :  { %2308 = vsyncadd [#allocation15], 4294959072 }
  0xd2   :  { %2309 = dma.done.wait [#allocation18], 8224  }
  0xd3   :  { %2310 = vsyncadd [#allocation18], 4294959072 }
  0xd4   :  { %2311 = dma.done.wait [#allocation21], 32  }
  0xd5   :  { %2312 = vsyncadd [#allocation21], 4294967264  ;;  %v274_v0 = vld [vmem:[#allocation13 + $0x8] sm:$0xff]  ;;  %v276_v1 = vld [vmem:[#allocation13 + $0x18] sm:$0xff]  ;;  %vm2331_vm0 = vmmov 0   ;;  %vm815_vm3 = vcmask 64512  }
  0xd6   :  { %v210_v2 = vld [vmem:[#allocation10 + $0x8] sm:$0xff]  ;;  %v1690_v3 = vpack.c.bf16 %v276_v1, %v274_v0  ;;  %v212_v4 = vld [vmem:[#allocation10 + $0x18] sm:$0xff]  ;;  %v209_v9 = vld [vmem:[#allocation10] sm:$0xff]  ;;  %s2333_s11 = smov [#allocation22]  }
  0xd7   :  { %v273_v5 = vld [vmem:[#allocation13] sm:$0xff]  ;;  %v275_v6 = vld [vmem:[#allocation13 + $0x10] sm:$0xff]  ;;  %v1626_v7 = vpack.c.bf16 %v212_v4, %v210_v2  ;;  %v278_v11 = vld [vmem:[#allocation13 + $0x28] sm:$0xff]  ;;  %s1548_s21 = sshll.u32 %s2333_s11, 4  ;;  %s1549_s21 = int_to_ptr.vmem [resolvable:$true] %s1548_s21 }
  0xd8   :  { %v1692_v8 = vpack.c.bf16 %v275_v6, %v273_v5  ;;  %v211_v10 = vld [vmem:[#allocation10 + $0x10] sm:$0xff]  ;;  %1691 = vmatprep.subr.bf16.mxu1 %v1690_v3  ;;  %v280_v13 = vld [vmem:[#allocation13 + $0x38] sm:$0xff]  ;;  %v214_v14 = vld [vmem:[#allocation10 + $0x28] sm:$0xff]  ;;  %s2277_s6 = scalar_lea.vmem %s1549_s21, 512  ;;  %p2282_p13 = scmp.lt.s32.totalorder %s1549_s21, %s1549_s21 }
  0xd9   :  { %v1628_v12 = vpack.c.bf16 %v211_v10, %v209_v9  ;;  %v216_v15 = vld [vmem:[#allocation10 + $0x38] sm:$0xff]  ;;  %1627 = vmatprep.subr.bf16.mxu0 %v1626_v7  ;;  %v1694_v16 = vpack.c.bf16 %v280_v13, %v278_v11  ;;  %v277_v18 = vld [vmem:[#allocation13 + $0x20] sm:$0xff]  ;;  %v215_v22 = vld [vmem:[#allocation10 + $0x30] sm:$0xff]  ;;  %p2278_p12 = scmp.ne.s32.totalorder %s1549_s21, %s2277_s6  ;;  %p2283_p0 = scmp.lt.s32.totalorder %s2277_s6, %s2277_s6 }
  0xda   :  { %1693 = vmatpush1.bf16.msra.mxu1 %v1692_v8  ;;  %v1630_v17 = vpack.c.bf16 %v216_v15, %v214_v14  ;;  %v279_v19 = vld [vmem:[#allocation13 + $0x30] sm:$0xff]  ;;  %v213_v20 = vld [vmem:[#allocation10 + $0x20] sm:$0xff]  ;;  %v282_v23 = vld [vmem:[#allocation13 + $0x48] sm:$0xff] }
  0xdb   :  { %1629 = vmatpush1.bf16.msra.mxu0 %v1628_v12  ;;  %v1696_v21 = vpack.c.bf16 %v279_v19, %v277_v18  ;;  %v284_v24 = vld [vmem:[#allocation13 + $0x58] sm:$0xff]  ;;  %1695 = vmatprep.subr.bf16.mxu1 %v1694_v16  ;;  %v1632_v25 = vpack.c.bf16 %v215_v22, %v213_v20  ;;  %v218_v27 = vld [vmem:[#allocation10 + $0x48] sm:$0xff]  ;;  %v283_v31 = vld [vmem:[#allocation13 + $0x50] sm:$0xff]  ;;  %p2284_p1 = por %p2283_p0, %p2282_p13 }
  0xdc   :  { %1631 = vmatprep.subr.bf16.mxu0 %v1630_v17  ;;  %v1698_v26 = vpack.c.bf16 %v284_v24, %v282_v23  ;;  %v220_v28 = vld [vmem:[#allocation10 + $0x58] sm:$0xff]  ;;  %v281_v29 = vld [vmem:[#allocation13 + $0x40] sm:$0xff]  ;;  %v219_v33 = vld [vmem:[#allocation10 + $0x50] sm:$0xff] }
  0xdd   :  { %v1634_v30 = vpack.c.bf16 %v220_v28, %v218_v27  ;;  %v217_v32 = vld [vmem:[#allocation10 + $0x40] sm:$0xff]  ;;  %v1700_v34 = vpack.c.bf16 %v283_v31, %v281_v29  ;;  %v286_v35 = vld [vmem:[#allocation13 + $0x68] sm:$0xff]  ;;  %v224_v40 = vld [vmem:[#allocation10 + $0x78] sm:$0xff]  ;;  %p2285_p2 = pnand %p2284_p1, %p2278_p12 }
  0xde   :  { %1697 = vmatpush1.bf16.msra.mxu1 %v1696_v21  ;;  %v288_v36 = vld [vmem:[#allocation13 + $0x78] sm:$0xff]  ;;  %v222_v37 = vld [vmem:[#allocation10 + $0x68] sm:$0xff]  ;;  %v1636_v38 = vpack.c.bf16 %v219_v33, %v217_v32  ;;  %v287_v42 = vld [vmem:[#allocation13 + $0x70] sm:$0xff] }
  0xdf   :  { %1633 = vmatpush1.bf16.msra.mxu0 %v1632_v25  ;;  %1699 = vmatprep.subr.bf16.mxu1 %v1698_v26  ;;  %v1702_v39 = vpack.c.bf16 %v288_v36, %v286_v35  ;;  %v285_v41 = vld [vmem:[#allocation13 + $0x60] sm:$0xff]  ;;  %v1638_v43 = vpack.c.bf16 %v224_v40, %v222_v37  ;;  %v223_v45 = vld [vmem:[#allocation10 + $0x70] sm:$0xff]  ;;  %v292_v47 = vld [vmem:[#allocation13 + $0x98] sm:$0xff] }
  0xe0   :  { %1635 = vmatprep.subr.bf16.mxu0 %v1634_v30  ;;  %v221_v44 = vld [vmem:[#allocation10 + $0x60] sm:$0xff]  ;;  %v290_v46 = vld [vmem:[#allocation13 + $0x88] sm:$0xff]  ;;  %v228_v49 = vld [vmem:[#allocation10 + $0x98] sm:$0xff]  ;;  %v1704_v50 = vpack.c.bf16 %v287_v42, %v285_v41 }
  0xe1   :  { %v226_v48 = vld [vmem:[#allocation10 + $0x88] sm:$0xff]  ;;  %v1640_v51 = vpack.c.bf16 %v223_v45, %v221_v44  ;;  %v1706_v52 = vpack.c.bf16 %v292_v47, %v290_v46  ;;  %v291_v54 = vld [vmem:[#allocation13 + $0x90] sm:$0xff]  ;;  %v225_v55 = vld [vmem:[#allocation10 + $0x80] sm:$0xff] }
  0xe2   :  { %1701 = vmatpush1.bf16.msra.mxu1 %v1700_v34  ;;  %v289_v53 = vld [vmem:[#allocation13 + $0x80] sm:$0xff]  ;;  %v1642_v56 = vpack.c.bf16 %v228_v49, %v226_v48  ;;  %v227_v57 = vld [vmem:[#allocation10 + $0x90] sm:$0xff]  ;;  %v296_v59 = vld [vmem:[#allocation13 + $0xb8] sm:$0xff] }
  0xe3   :  { %1637 = vmatpush1.bf16.msra.mxu0 %v1636_v38  ;;  %1703 = vmatprep.subr.bf16.mxu1 %v1702_v39  ;;  %v294_v58 = vld [vmem:[#allocation13 + $0xa8] sm:$0xff]  ;;  %v232_v61 = vld [vmem:[#allocation10 + $0xb8] sm:$0xff]  ;;  %v1708_v62 = vpack.c.bf16 %v291_v54, %v289_v53  ;;  %v1644_v63 = vpack.c.bf16 %v227_v57, %v225_v55  ;;  %v293_v1 = vld [vmem:[#allocation13 + $0xa0] sm:$0xff] }
  0xe4   :  { %1639 = vmatprep.subr.bf16.mxu0 %v1638_v43  ;;  %v230_v60 = vld [vmem:[#allocation10 + $0xa8] sm:$0xff]  ;;  %v1710_v0 = vpack.c.bf16 %v296_v59, %v294_v58  ;;  %v295_v2 = vld [vmem:[#allocation13 + $0xb0] sm:$0xff]  ;;  %v229_v3 = vld [vmem:[#allocation10 + $0xa0] sm:$0xff] }
  0xe5   :  { %v1646_v4 = vpack.c.bf16 %v232_v61, %v230_v60  ;;  %v231_v5 = vld [vmem:[#allocation10 + $0xb0] sm:$0xff]  ;;  %v300_v7 = vld [vmem:[#allocation13 + $0xd8] sm:$0xff]  ;;  %v234_v8 = vld [vmem:[#allocation10 + $0xc8] sm:$0xff]  ;;  %v1712_v10 = vpack.c.bf16 %v295_v2, %v293_v1 }
  0xe6   :  { %1705 = vmatpush1.bf16.msra.mxu1 %v1704_v50  ;;  %v298_v6 = vld [vmem:[#allocation13 + $0xc8] sm:$0xff]  ;;  %v236_v9 = vld [vmem:[#allocation10 + $0xd8] sm:$0xff]  ;;  %v1648_v11 = vpack.c.bf16 %v231_v5, %v229_v3  ;;  %v297_v13 = vld [vmem:[#allocation13 + $0xc0] sm:$0xff] }
  0xe7   :  { %1641 = vmatpush1.bf16.msra.mxu0 %v1640_v51  ;;  %1707 = vmatprep.subr.bf16.mxu1 %v1706_v52  ;;  %v1714_v12 = vpack.c.bf16 %v300_v7, %v298_v6  ;;  %v299_v14 = vld [vmem:[#allocation13 + $0xd0] sm:$0xff]  ;;  %v233_v15 = vld [vmem:[#allocation10 + $0xc0] sm:$0xff]  ;;  %v1650_v16 = vpack.c.bf16 %v236_v9, %v234_v8  ;;  %v302_v18 = vld [vmem:[#allocation13 + $0xe8] sm:$0xff] }
  0xe8   :  { %1643 = vmatprep.subr.bf16.mxu0 %v1642_v56  ;;  %v235_v17 = vld [vmem:[#allocation10 + $0xd0] sm:$0xff]  ;;  %v304_v19 = vld [vmem:[#allocation13 + $0xf8] sm:$0xff]  ;;  %v238_v20 = vld [vmem:[#allocation10 + $0xe8] sm:$0xff]  ;;  %v1716_v22 = vpack.c.bf16 %v299_v14, %v297_v13 }
  0xe9   :  { %v240_v21 = vld [vmem:[#allocation10 + $0xf8] sm:$0xff]  ;;  %v1652_v23 = vpack.c.bf16 %v235_v17, %v233_v15  ;;  %v1718_v24 = vpack.c.bf16 %v304_v19, %v302_v18  ;;  %v301_v25 = vld [vmem:[#allocation13 + $0xe0] sm:$0xff]  ;;  %v239_v29 = vld [vmem:[#allocation10 + $0xf0] sm:$0xff] }
  0xea   :  { %1709 = vmatpush1.bf16.msra.mxu1 %v1708_v62  ;;  %v303_v26 = vld [vmem:[#allocation13 + $0xf0] sm:$0xff]  ;;  %v237_v27 = vld [vmem:[#allocation10 + $0xe0] sm:$0xff]  ;;  %v1654_v28 = vpack.c.bf16 %v240_v21, %v238_v20  ;;  %v306_v30 = vld [vmem:[#allocation13 + $0x108] sm:$0xff] }
  0xeb   :  { %1645 = vmatpush1.bf16.msra.mxu0 %v1644_v63  ;;  %1711 = vmatprep.subr.bf16.mxu1 %v1710_v0  ;;  %v308_v31 = vld [vmem:[#allocation13 + $0x118] sm:$0xff]  ;;  %v242_v32 = vld [vmem:[#allocation10 + $0x108] sm:$0xff]  ;;  %v1720_v34 = vpack.c.bf16 %v303_v26, %v301_v25  ;;  %v1656_v35 = vpack.c.bf16 %v239_v29, %v237_v27  ;;  %v307_v38 = vld [vmem:[#allocation13 + $0x110] sm:$0xff] }
  0xec   :  { %1647 = vmatprep.subr.bf16.mxu0 %v1646_v4  ;;  %v244_v33 = vld [vmem:[#allocation10 + $0x118] sm:$0xff]  ;;  %v1722_v36 = vpack.c.bf16 %v308_v31, %v306_v30  ;;  %v305_v37 = vld [vmem:[#allocation13 + $0x100] sm:$0xff]  ;;  %v243_v41 = vld [vmem:[#allocation10 + $0x110] sm:$0xff] }
  0xed   :  { %v241_v39 = vld [vmem:[#allocation10 + $0x100] sm:$0xff]  ;;  %v1658_v40 = vpack.c.bf16 %v244_v33, %v242_v32  ;;  %v310_v42 = vld [vmem:[#allocation13 + $0x128] sm:$0xff]  ;;  %v248_v45 = vld [vmem:[#allocation10 + $0x138] sm:$0xff]  ;;  %v1724_v46 = vpack.c.bf16 %v307_v38, %v305_v37 }
  0xee   :  { %1713 = vmatpush1.bf16.msra.mxu1 %v1712_v10  ;;  %v312_v43 = vld [vmem:[#allocation13 + $0x138] sm:$0xff]  ;;  %v246_v44 = vld [vmem:[#allocation10 + $0x128] sm:$0xff]  ;;  %v1660_v47 = vpack.c.bf16 %v243_v41, %v241_v39  ;;  %v311_v50 = vld [vmem:[#allocation13 + $0x130] sm:$0xff] }
  0xef   :  { %1649 = vmatpush1.bf16.msra.mxu0 %v1648_v11  ;;  %1715 = vmatprep.subr.bf16.mxu1 %v1714_v12  ;;  %v1726_v48 = vpack.c.bf16 %v312_v43, %v310_v42  ;;  %v309_v49 = vld [vmem:[#allocation13 + $0x120] sm:$0xff]  ;;  %v1662_v52 = vpack.c.bf16 %v248_v45, %v246_v44  ;;  %v247_v53 = vld [vmem:[#allocation10 + $0x130] sm:$0xff]  ;;  %v316_v55 = vld [vmem:[#allocation13 + $0x158] sm:$0xff] }
  0xf0   :  { %1651 = vmatprep.subr.bf16.mxu0 %v1650_v16  ;;  %v245_v51 = vld [vmem:[#allocation10 + $0x120] sm:$0xff]  ;;  %v314_v54 = vld [vmem:[#allocation13 + $0x148] sm:$0xff]  ;;  %v252_v57 = vld [vmem:[#allocation10 + $0x158] sm:$0xff]  ;;  %v1728_v58 = vpack.c.bf16 %v311_v50, %v309_v49 }
  0xf1   :  { %v250_v56 = vld [vmem:[#allocation10 + $0x148] sm:$0xff]  ;;  %v1664_v59 = vpack.c.bf16 %v247_v53, %v245_v51  ;;  %v1730_v60 = vpack.c.bf16 %v316_v55, %v314_v54  ;;  %v315_v62 = vld [vmem:[#allocation13 + $0x150] sm:$0xff]  ;;  %v249_v63 = vld [vmem:[#allocation10 + $0x140] sm:$0xff] }
  0xf2   :  { %1717 = vmatpush1.bf16.msra.mxu1 %v1716_v22  ;;  %v313_v61 = vld [vmem:[#allocation13 + $0x140] sm:$0xff]  ;;  %v1666_v0 = vpack.c.bf16 %v252_v57, %v250_v56  ;;  %v251_v1 = vld [vmem:[#allocation10 + $0x150] sm:$0xff]  ;;  %v320_v3 = vld [vmem:[#allocation13 + $0x178] sm:$0xff] }
  0xf3   :  { %1653 = vmatpush1.bf16.msra.mxu0 %v1652_v23  ;;  %1719 = vmatprep.subr.bf16.mxu1 %v1718_v24  ;;  %v318_v2 = vld [vmem:[#allocation13 + $0x168] sm:$0xff]  ;;  %v256_v5 = vld [vmem:[#allocation10 + $0x178] sm:$0xff]  ;;  %v1732_v6 = vpack.c.bf16 %v315_v62, %v313_v61  ;;  %v317_v7 = vld [vmem:[#allocation13 + $0x160] sm:$0xff]  ;;  %v1668_v8 = vpack.c.bf16 %v251_v1, %v249_v63 }
  0xf4   :  { %1655 = vmatprep.subr.bf16.mxu0 %v1654_v28  ;;  %v254_v4 = vld [vmem:[#allocation10 + $0x168] sm:$0xff]  ;;  %v1734_v9 = vpack.c.bf16 %v320_v3, %v318_v2  ;;  %v319_v10 = vld [vmem:[#allocation13 + $0x170] sm:$0xff]  ;;  %v253_v11 = vld [vmem:[#allocation10 + $0x160] sm:$0xff] }
  0xf5   :  { %v255_v12 = vld [vmem:[#allocation10 + $0x170] sm:$0xff]  ;;  %v1670_v13 = vpack.c.bf16 %v256_v5, %v254_v4  ;;  %v324_v15 = vld [vmem:[#allocation13 + $0x198] sm:$0xff]  ;;  %v202_v16 = vld [vmem:[#allocation5 + $0x8] sm:$0xff]  ;;  %v1736_v20 = vpack.c.bf16 %v319_v10, %v317_v7 }
  0xf6   :  { %1721 = vmatpush1.bf16.msra.mxu1 %v1720_v34  ;;  %v322_v14 = vld [vmem:[#allocation13 + $0x188] sm:$0xff]  ;;  %v260_v18 = vld [vmem:[#allocation10 + $0x198] sm:$0xff]  ;;  %630 = vmatprep.mubr.f32.mxu1 %v202_v16  ;;  %v1672_v21 = vpack.c.bf16 %v255_v12, %v253_v11  ;;  %v321_v23 = vld [vmem:[#allocation13 + $0x180] sm:$0xff] }
  0xf7   :  { %1657 = vmatpush1.bf16.msra.mxu0 %v1656_v35  ;;  %1723 = vmatprep.subr.bf16.mxu1 %v1722_v36  ;;  %v258_v17 = vld [vmem:[#allocation10 + $0x188] sm:$0xff]  ;;  %v1738_v22 = vpack.c.bf16 %v324_v15, %v322_v14  ;;  %v323_v24 = vld [vmem:[#allocation13 + $0x190] sm:$0xff]  ;;  %v257_v25 = vld [vmem:[#allocation10 + $0x180] sm:$0xff] }
  0xf8   :  { %1659 = vmatprep.subr.bf16.mxu0 %v1658_v40  ;;  %v198_v19 = vld [vmem:[#allocation2 + $0x8] sm:$0xff]  ;;  %v1674_v26 = vpack.c.bf16 %v260_v18, %v258_v17  ;;  %v259_v27 = vld [vmem:[#allocation10 + $0x190] sm:$0xff]  ;;  %v328_v29 = vld [vmem:[#allocation13 + $0x1b8] sm:$0xff]  ;;  %v1740_v32 = vpack.c.bf16 %v323_v24, %v321_v23 }
  0xf9   :  { %541 = vmatprep.mubr.f32.mxu0 %v198_v19  ;;  %v326_v28 = vld [vmem:[#allocation13 + $0x1a8] sm:$0xff]  ;;  %v264_v31 = vld [vmem:[#allocation10 + $0x1b8] sm:$0xff]  ;;  %v1676_v33 = vpack.c.bf16 %v259_v27, %v257_v25  ;;  %v325_v35 = vld [vmem:[#allocation13 + $0x1a0] sm:$0xff] }
  0xfa   :  { %1725 = vmatpush1.bf16.msra.mxu1 %v1724_v46  ;;  %v262_v30 = vld [vmem:[#allocation10 + $0x1a8] sm:$0xff]  ;;  %v1742_v34 = vpack.c.bf16 %v328_v29, %v326_v28  ;;  %v327_v36 = vld [vmem:[#allocation13 + $0x1b0] sm:$0xff]  ;;  %v261_v37 = vld [vmem:[#allocation10 + $0x1a0] sm:$0xff] }
  0xfb   :  { %1661 = vmatpush1.bf16.msra.mxu0 %v1660_v47  ;;  %1727 = vmatprep.subr.bf16.mxu1 %v1726_v48  ;;  %v1678_v38 = vpack.c.bf16 %v264_v31, %v262_v30  ;;  %v263_v39 = vld [vmem:[#allocation10 + $0x1b0] sm:$0xff]  ;;  %v332_v41 = vld [vmem:[#allocation13 + $0x1d8] sm:$0xff]  ;;  %v266_v42 = vld [vmem:[#allocation10 + $0x1c8] sm:$0xff]  ;;  %v1744_v44 = vpack.c.bf16 %v327_v36, %v325_v35 }
  0xfc   :  { %1663 = vmatprep.subr.bf16.mxu0 %v1662_v52  ;;  %v330_v40 = vld [vmem:[#allocation13 + $0x1c8] sm:$0xff]  ;;  %v268_v43 = vld [vmem:[#allocation10 + $0x1d8] sm:$0xff]  ;;  %v1680_v45 = vpack.c.bf16 %v263_v39, %v261_v37  ;;  %v329_v47 = vld [vmem:[#allocation13 + $0x1c0] sm:$0xff] }
  0xfd   :  { %v1746_v46 = vpack.c.bf16 %v332_v41, %v330_v40  ;;  %v331_v48 = vld [vmem:[#allocation13 + $0x1d0] sm:$0xff]  ;;  %v265_v49 = vld [vmem:[#allocation10 + $0x1c0] sm:$0xff]  ;;  %v1682_v50 = vpack.c.bf16 %v268_v43, %v266_v42  ;;  %v334_v52 = vld [vmem:[#allocation13 + $0x1e8] sm:$0xff] }
  0xfe   :  { %1729 = vmatpush1.bf16.msra.mxu1 %v1728_v58  ;;  %v267_v51 = vld [vmem:[#allocation10 + $0x1d0] sm:$0xff]  ;;  %v336_v53 = vld [vmem:[#allocation13 + $0x1f8] sm:$0xff]  ;;  %v270_v54 = vld [vmem:[#allocation10 + $0x1e8] sm:$0xff]  ;;  %v1748_v56 = vpack.c.bf16 %v331_v48, %v329_v47 }
  0xff   :  { %1665 = vmatpush1.bf16.msra.mxu0 %v1664_v59  ;;  %1731 = vmatprep.subr.bf16.mxu1 %v1730_v60  ;;  %v272_v55 = vld [vmem:[#allocation10 + $0x1f8] sm:$0xff]  ;;  %v1684_v57 = vpack.c.bf16 %v267_v51, %v265_v49  ;;  %v1750_v58 = vpack.c.bf16 %v336_v53, %v334_v52  ;;  %v333_v59 = vld [vmem:[#allocation13 + $0x1e0] sm:$0xff]  ;;  %v271_v63 = vld [vmem:[#allocation10 + $0x1f0] sm:$0xff] }
 0x100   :  { %1667 = vmatprep.subr.bf16.mxu0 %v1666_v0  ;;  %v335_v60 = vld [vmem:[#allocation13 + $0x1f0] sm:$0xff]  ;;  %v269_v61 = vld [vmem:[#allocation10 + $0x1e0] sm:$0xff]  ;;  %v1686_v62 = vpack.c.bf16 %v272_v55, %v270_v54 }
 0x101   :  { %v338_v0 = vld [vmem:[#allocation16 + $0x8] sm:$0xff]  ;;  %v340_v1 = vld [vmem:[#allocation16 + $0x18] sm:$0xff]  ;;  %v1752_v2 = vpack.c.bf16 %v335_v60, %v333_v59  ;;  %v1688_v3 = vpack.c.bf16 %v271_v63, %v269_v61  ;;  %v337_v5 = vld [vmem:[#allocation16] sm:$0xff] }
 0x102   :  { %1733 = vmatpush1.bf16.msra.mxu1 %v1732_v6  ;;  %v1754_v4 = vpack.c.bf16 %v340_v1, %v338_v0  ;;  %v339_v6 = vld [vmem:[#allocation16 + $0x10] sm:$0xff]  ;;  %v342_v7 = vld [vmem:[#allocation16 + $0x28] sm:$0xff]  ;;  %v197_v10 = vld [vmem:[#allocation2] sm:$0xff] }
 0x103   :  { %1669 = vmatpush1.bf16.msra.mxu0 %v1668_v8  ;;  %1735 = vmatprep.subr.bf16.mxu1 %v1734_v9  ;;  %v344_v8 = vld [vmem:[#allocation16 + $0x38] sm:$0xff]  ;;  %v1756_v12 = vpack.c.bf16 %v339_v6, %v337_v5  ;;  %v341_v15 = vld [vmem:[#allocation16 + $0x20] sm:$0xff]  ;;  %v343_v16 = vld [vmem:[#allocation16 + $0x30] sm:$0xff] }
 0x104   :  { %1671 = vmatprep.subr.bf16.mxu0 %v1670_v13  ;;  %v201_v9 = vld [vmem:[#allocation5] sm:$0xff]  ;;  %v204_v11 = vld [vmem:[#allocation5 + $0x18] sm:$0xff]  ;;  %v1758_v14 = vpack.c.bf16 %v344_v8, %v342_v7  ;;  %v346_v17 = vld [vmem:[#allocation16 + $0x48] sm:$0xff] }
 0x105   :  { %v200_v13 = vld [vmem:[#allocation2 + $0x18] sm:$0xff]  ;;  %v203_v19 = vld [vmem:[#allocation5 + $0x10] sm:$0xff]  ;;  %v345_v23 = vld [vmem:[#allocation16 + $0x40] sm:$0xff] }
 0x106   :  { %1737 = vmatpush1.bf16.msra.mxu1 %v1736_v20  ;;  %v348_v18 = vld [vmem:[#allocation16 + $0x58] sm:$0xff]  ;;  %v199_v20 = vld [vmem:[#allocation2 + $0x10] sm:$0xff]  ;;  %v349_v29 = vld [vmem:[#allocation16 + $0x60] sm:$0xff] }
 0x107   :  { %1673 = vmatpush1.bf16.msra.mxu0 %v1672_v21  ;;  %1739 = vmatprep.subr.bf16.mxu1 %v1738_v22  ;;  %v1760_v21 = vpack.c.bf16 %v343_v16, %v341_v15  ;;  %v1762_v22 = vpack.c.bf16 %v348_v18, %v346_v17  ;;  %v347_v24 = vld [vmem:[#allocation16 + $0x50] sm:$0xff]  ;;  %v350_v25 = vld [vmem:[#allocation16 + $0x68] sm:$0xff]  ;;  %v353_v35 = vld [vmem:[#allocation16 + $0x80] sm:$0xff] }
 0x108   :  { %1675 = vmatprep.subr.bf16.mxu0 %v1674_v26  ;;  %v352_v26 = vld [vmem:[#allocation16 + $0x78] sm:$0xff]  ;;  %v1764_v27 = vpack.c.bf16 %v347_v24, %v345_v23  ;;  %v351_v30 = vld [vmem:[#allocation16 + $0x70] sm:$0xff]  ;;  %v354_v31 = vld [vmem:[#allocation16 + $0x88] sm:$0xff] }
 0x109   :  { %v1766_v28 = vpack.c.bf16 %v352_v26, %v350_v25  ;;  %v355_v36 = vld [vmem:[#allocation16 + $0x90] sm:$0xff]  ;;  %v358_v37 = vld [vmem:[#allocation16 + $0xa8] sm:$0xff]  ;;  %v357_v41 = vld [vmem:[#allocation16 + $0xa0] sm:$0xff] }
 0x10a   :  { %1741 = vmatpush1.bf16.msra.mxu1 %v1740_v32  ;;  %v356_v32 = vld [vmem:[#allocation16 + $0x98] sm:$0xff]  ;;  %v1772_v39 = vpack.c.bf16 %v355_v36, %v353_v35  ;;  %v359_v42 = vld [vmem:[#allocation16 + $0xb0] sm:$0xff]  ;;  %v362_v43 = vld [vmem:[#allocation16 + $0xc8] sm:$0xff] }
 0x10b   :  { %1677 = vmatpush1.bf16.msra.mxu0 %v1676_v33  ;;  %1743 = vmatprep.subr.bf16.mxu1 %v1742_v34  ;;  %v1768_v33 = vpack.c.bf16 %v351_v30, %v349_v29  ;;  %v1770_v34 = vpack.c.bf16 %v356_v32, %v354_v31  ;;  %v361_v47 = vld [vmem:[#allocation16 + $0xc0] sm:$0xff]  ;;  %v363_v48 = vld [vmem:[#allocation16 + $0xd0] sm:$0xff]  ;;  %v366_v49 = vld [vmem:[#allocation16 + $0xe8] sm:$0xff] }
 0x10c   :  { %1679 = vmatprep.subr.bf16.mxu0 %v1678_v38  ;;  %v360_v38 = vld [vmem:[#allocation16 + $0xb8] sm:$0xff]  ;;  %v1780_v51 = vpack.c.bf16 %v363_v48, %v361_v47  ;;  %v365_v53 = vld [vmem:[#allocation16 + $0xe0] sm:$0xff]  ;;  %v367_v54 = vld [vmem:[#allocation16 + $0xf0] sm:$0xff] }
 0x10d   :  { %v1774_v40 = vpack.c.bf16 %v360_v38, %v358_v37  ;;  %v370_v55 = vld [vmem:[#allocation16 + $0x108] sm:$0xff]  ;;  %v369_v59 = vld [vmem:[#allocation16 + $0x100] sm:$0xff]  ;;  %v371_v60 = vld [vmem:[#allocation16 + $0x110] sm:$0xff] }
 0x10e   :  { %1745 = vmatpush1.bf16.msra.mxu1 %v1744_v44  ;;  %v364_v44 = vld [vmem:[#allocation16 + $0xd8] sm:$0xff]  ;;  %v374_v61 = vld [vmem:[#allocation16 + $0x128] sm:$0xff]  ;;  %v1788_v63 = vpack.c.bf16 %v371_v60, %v369_v59  ;;  %v373_v1 = vld [vmem:[#allocation16 + $0x120] sm:$0xff] }
 0x10f   :  { %1681 = vmatpush1.bf16.msra.mxu0 %v1680_v45  ;;  %1747 = vmatprep.subr.bf16.mxu1 %v1746_v46  ;;  %v1776_v45 = vpack.c.bf16 %v359_v42, %v357_v41  ;;  %v1778_v46 = vpack.c.bf16 %v364_v44, %v362_v43  ;;  %v377_v7 = vld [vmem:[#allocation16 + $0x140] sm:$0xff]  ;;  %v379_v8 = vld [vmem:[#allocation16 + $0x150] sm:$0xff]  ;;  %v386_v15 = vld [vmem:[#allocation16 + $0x188] sm:$0xff]  ;;  %v2330_v42 = vmov 0.0  }
 0x110   :  { %1683 = vmatprep.subr.bf16.mxu0 %v1682_v50  ;;  %v368_v50 = vld [vmem:[#allocation16 + $0xf8] sm:$0xff]  ;;  %v389_v25 = vld [vmem:[#allocation16 + $0x1a0] sm:$0xff]  ;;  %v391_v26 = vld [vmem:[#allocation16 + $0x1b0] sm:$0xff] }
 0x111   :  { %v1782_v52 = vpack.c.bf16 %v368_v50, %v366_v49  ;;  %v388_v16 = vld [vmem:[#allocation16 + $0x198] sm:$0xff]  ;;  %v1808_v29 = vpack.c.bf16 %v391_v26, %v389_v25  ;;  %v393_v31 = vld [vmem:[#allocation16 + $0x1c0] sm:$0xff]  ;;  %v395_v32 = vld [vmem:[#allocation16 + $0x1d0] sm:$0xff] }
 0x112   :  { %1749 = vmatpush1.bf16.msra.mxu1 %v1748_v56  ;;  %v372_v56 = vld [vmem:[#allocation16 + $0x118] sm:$0xff]  ;;  %v1802_v18 = vpack.c.bf16 %v388_v16, %v386_v15  ;;  %v1812_v35 = vpack.c.bf16 %v395_v32, %v393_v31  ;;  %v397_v37 = vld [vmem:[#allocation16 + $0x1e0] sm:$0xff]  ;;  %v399_v38 = vld [vmem:[#allocation16 + $0x1f0] sm:$0xff]  ;;  %v2332_v16 = vmov -1e+09  }
 0x113   :  { %1685 = vmatpush1.bf16.msra.mxu0 %v1684_v57  ;;  %1751 = vmatprep.subr.bf16.mxu1 %v1750_v58  ;;  %v1784_v57 = vpack.c.bf16 %v367_v54, %v365_v53  ;;  %v1786_v58 = vpack.c.bf16 %v372_v56, %v370_v55  ;;  %v207_v41 = vld [vmem:[#allocation7 + $0x10] sm:$0xff]  ;;  %v206_v43 = vld [vmem:[#allocation7 + $0x8] sm:$0xff]  ;;  %v205_v44 = vld [vmem:[#allocation7] sm:$0xff] }
 0x114   :  { %1687 = vmatprep.subr.bf16.mxu0 %v1686_v62  ;;  %v376_v62 = vld [vmem:[#allocation16 + $0x138] sm:$0xff] }
 0x115   :  { %v1790_v0 = vpack.c.bf16 %v376_v62, %v374_v61  ;;  %v2581_v48 = vld [vmem:[#allocation14] sm:$0x3]  ;;  %v465_v49 = vld [vmem:[#allocation11] sm:$0x3]  ;;  %v1140_v15 = vld [vmem:[#allocation8 + $0x1] sm:$0x1] }
 0x116   :  { %1753 = vmatpush1.bf16.msra.mxu1 %v1752_v2  ;;  %v375_v2 = vld [vmem:[#allocation16 + $0x130] sm:$0xff]  ;;  %vm1141_vm2 = vcmp.gt.f32.partialorder %v1140_v15, 0.0 }
 0x117   :  { %1689 = vmatpush1.bf16.msra.mxu0 %v1688_v3  ;;  %1946 = vmatprep.subr.bf16.mxu1 %v1754_v4  ;;  %v378_v3 = vld [vmem:[#allocation16 + $0x148] sm:$0xff]  ;;  %v1792_v5 = vpack.c.bf16 %v375_v2, %v373_v1 }
 0x118   :  { %1755 = vmatprep.subr.bf16.mxu0 %v1754_v4  ;;  %v380_v4 = vld [vmem:[#allocation16 + $0x158] sm:$0xff] }
 0x119   :  { %631 = vmatmul.mubr.f32.vlgmr.msra.gmra.mrb[0].mxu1 %v201_v9  ;;  %v1794_v6 = vpack.c.bf16 %v380_v4, %v378_v3  ;;  %v382_v9 = vld [vmem:[#allocation16 + $0x168] sm:$0xff] }
 0x11a   :  { %542 = vmatmul.mubr.f32.vlgmr.msra.gmra.mrb[0].mxu0 %v197_v10  ;;  %636 = vmatprep.mubr.f32.mxu1 %v204_v11  ;;  %v384_v10 = vld [vmem:[#allocation16 + $0x178] sm:$0xff]  ;;  %v1796_v11 = vpack.c.bf16 %v379_v8, %v377_v7 }
 0x11b   :  { %547 = vmatprep.mubr.f32.mxu0 %v200_v13  ;;  %1962 = vmatpush1.bf16.msra.mxu1 %v1756_v12  ;;  %v381_v13 = vld [vmem:[#allocation16 + $0x160] sm:$0xff] }
 0x11c   :  { %1947 = vmatprep.subr.bf16.mxu1 %v1758_v14  ;;  %1757 = vmatpush1.bf16.msra.mxu0 %v1756_v12  ;;  %v1798_v12 = vpack.c.bf16 %v384_v10, %v382_v9 }
 0x11d   :  { %637 = vmatmul.mubr.f32.gmra.mrb[2].mxu1 %v203_v19  ;;  %1759 = vmatprep.subr.bf16.mxu0 %v1758_v14  ;;  %v383_v14 = vld [vmem:[#allocation16 + $0x170] sm:$0xff]  ;;  %v385_v19 = vld [vmem:[#allocation16 + $0x180] sm:$0xff] }
 0x11e   :  { %548 = vmatmul.mubr.f32.gmra.mrb[2].mxu0 %v199_v20  ;;  %v1800_v17 = vpack.c.bf16 %v383_v14, %v381_v13  ;;  %v387_v20 = vld [vmem:[#allocation16 + $0x190] sm:$0xff]  ;;  %v736_v14 = vld [vmem:[#allocation8] sm:$0x1] }
 0x11f   :  { %1963 = vmatpush1.bf16.msra.mxu1 %v1760_v21  ;;  %v1804_v23 = vpack.c.bf16 %v387_v20, %v385_v19  ;;  %719 = vmatprep.mubr.f32.mxu0 %v206_v43  ;;  %vm737_vm1 = vcmp.gt.f32.partialorder %v736_v14, 0.0  ;;  %v1142_v19 = vsel %vm1141_vm2, 0.0, %v2332_v16  ;;  %v404_v14 = vld [vmem:[#allocation19 + $0x18] sm:$0xff] }
 0x120   :  { %1948 = vmatprep.subr.bf16.mxu1 %v1762_v22  ;;  %1761 = vmatpush1.bf16.msra.mxu0 %v1760_v21  ;;  %v390_v21 = vld [vmem:[#allocation16 + $0x1a8] sm:$0xff] }
 0x121   :  { %1763 = vmatprep.subr.bf16.mxu0 %v1762_v22  ;;  %v392_v22 = vld [vmem:[#allocation16 + $0x1b8] sm:$0xff] }
 0x122   :  { %v1806_v24 = vpack.c.bf16 %v392_v22, %v390_v21 }
 0x123   :  { %1964 = vmatpush1.bf16.msra.mxu1 %v1764_v27 }
 0x124   :  { %1949 = vmatprep.subr.bf16.mxu1 %v1766_v28  ;;  %1765 = vmatpush1.bf16.msra.mxu0 %v1764_v27  ;;  %v394_v27 = vld [vmem:[#allocation16 + $0x1c8] sm:$0xff] }
 0x125   :  { %1767 = vmatprep.subr.bf16.mxu0 %v1766_v28  ;;  %v396_v28 = vld [vmem:[#allocation16 + $0x1d8] sm:$0xff] }
 0x126   :  { %v1810_v30 = vpack.c.bf16 %v396_v28, %v394_v27 }
 0x127   :  { %1965 = vmatpush1.bf16.msra.mxu1 %v1768_v33 }
 0x128   :  { %1950 = vmatprep.subr.bf16.mxu1 %v1770_v34  ;;  %1769 = vmatpush1.bf16.msra.mxu0 %v1768_v33  ;;  %v398_v33 = vld [vmem:[#allocation16 + $0x1e8] sm:$0xff] }
 0x129   :  { %1771 = vmatprep.subr.bf16.mxu0 %v1770_v34  ;;  %v400_v34 = vld [vmem:[#allocation16 + $0x1f8] sm:$0xff] }
 0x12a   :  { %v1814_v36 = vpack.c.bf16 %v400_v34, %v398_v33 }
 0x12b   :  { %1966 = vmatpush1.bf16.msra.mxu1 %v1772_v39 }
 0x12c   :  { %1951 = vmatprep.subr.bf16.mxu1 %v1774_v40  ;;  %1773 = vmatpush1.bf16.msra.mxu0 %v1772_v39  ;;  %v1816_v39 = vpack.c.bf16 %v399_v38, %v397_v37 }
 0x12d   :  { %1775 = vmatprep.subr.bf16.mxu0 %v1774_v40  ;;  %v208_v40 = vld [vmem:[#allocation7 + $0x18] sm:$0xff] }
 0x12e   :  { %725 = vmatprep.mubr.f32.mxu1 %v208_v40 }
 0x12f   :  { %1967 = vmatpush1.bf16.msra.mxu1 %v1776_v45 }
 0x130   :  { %1952 = vmatprep.subr.bf16.mxu1 %v1778_v46  ;;  %1777 = vmatpush1.bf16.msra.mxu0 %v1776_v45  ;;  %v467_v45 = vlaneseq }
 0x131   :  { %1779 = vmatprep.subr.bf16.mxu0 %v1778_v46 }
 0x132   :  { %v468_v46 = vshrl.u32 %v467_v45, 7 }
 0x133   :  { %1968 = vmatpush1.bf16.msra.mxu1 %v1780_v51 }
 0x134   :  { %1953 = vmatprep.subr.bf16.mxu1 %v1782_v52  ;;  %1781 = vmatpush1.bf16.msra.mxu0 %v1780_v51  ;;  %v2579_v47 = vsub.s32 0, %v468_v46  ;;  %v2583_v50 = vsub.s32 1, %v468_v46 }
 0x135   :  { %1783 = vmatprep.subr.bf16.mxu0 %v1782_v52 }
 0x136   :  { %v559_v51 = vrot.slane %v2581_v48, %v2579_v47  ;;  %v470_v52 = vrot.slane %v465_v49, %v2579_v47  ;;  %v474_v53 = vrot.slane %v465_v49, %v2583_v50 }
 0x137   :  { %1969 = vmatpush1.bf16.msra.mxu1 %v1784_v57 }
 0x138   :  { %1954 = vmatprep.subr.bf16.mxu1 %v1786_v58  ;;  %1785 = vmatpush1.bf16.msra.mxu0 %v1784_v57 }
 0x139   :  { %1787 = vmatprep.subr.bf16.mxu0 %v1786_v58 }
 0x13b   :  { %1970 = vmatpush1.bf16.msra.mxu1 %v1788_v63 }
 0x13c   :  { %1955 = vmatprep.subr.bf16.mxu1 %v1790_v0  ;;  %1789 = vmatpush1.bf16.msra.mxu0 %v1788_v63 }
 0x13d   :  { %1791 = vmatprep.subr.bf16.mxu0 %v1790_v0 }
 0x13f   :  { %1971 = vmatpush1.bf16.msra.mxu1 %v1792_v5 }
 0x140   :  { %1956 = vmatprep.subr.bf16.mxu1 %v1794_v6  ;;  %1793 = vmatpush1.bf16.msra.mxu0 %v1792_v5 }
 0x141   :  { %1795 = vmatprep.subr.bf16.mxu0 %v1794_v6  ;;  %v643_v6 = vld [vmem:[#allocation17] sm:$0x3] }
 0x142   :  { %v648_v7 = vrot.slane %v643_v6, %v2579_v47  ;;  %v652_v49 = vrot.slane %v643_v6, %v2583_v50 }
 0x143   :  { %1972 = vmatpush1.bf16.msra.mxu1 %v1796_v11 }
 0x144   :  { %1957 = vmatprep.subr.bf16.mxu1 %v1798_v12  ;;  %1797 = vmatpush1.bf16.msra.mxu0 %v1796_v11 }
 0x145   :  { %1799 = vmatprep.subr.bf16.mxu0 %v1798_v12 }
 0x147   :  { %1973 = vmatpush1.bf16.msra.mxu1 %v1800_v17 }
 0x148   :  { %1958 = vmatprep.subr.bf16.mxu1 %v1802_v18  ;;  %1801 = vmatpush1.bf16.msra.mxu0 %v1800_v17  ;;  %v738_v17 = vsel %vm737_vm1, 0.0, %v2332_v16 }
 0x149   :  { %1803 = vmatprep.subr.bf16.mxu0 %v1802_v18  ;;  %v743_v18 = vrot.slane %v738_v17, %v2579_v47 }
 0x14b   :  { %1974 = vmatpush1.bf16.msra.mxu1 %v1804_v23 }
 0x14c   :  { %1959 = vmatprep.subr.bf16.mxu1 %v1806_v24  ;;  %1805 = vmatpush1.bf16.msra.mxu0 %v1804_v23  ;;  %v1147_v23 = vrot.slane %v1142_v19, %v2579_v47  ;;  %v403_v19 = vld [vmem:[#allocation19 + $0x10] sm:$0xff] }
 0x14d   :  { %1807 = vmatprep.subr.bf16.mxu0 %v1806_v24 }
 0x14f   :  { %1975 = vmatpush1.bf16.msra.mxu1 %v1808_v29 }
 0x150   :  { %1960 = vmatprep.subr.bf16.mxu1 %v1810_v30  ;;  %1809 = vmatpush1.bf16.msra.mxu0 %v1808_v29 }
 0x151   :  { %1811 = vmatprep.subr.bf16.mxu0 %v1810_v30 }
 0x153   :  { %1976 = vmatpush1.bf16.msra.mxu1 %v1812_v35 }
 0x154   :  { %1961 = vmatprep.subr.bf16.mxu1 %v1814_v36  ;;  %1813 = vmatpush1.bf16.msra.mxu0 %v1812_v35 }
 0x155   :  { %1815 = vmatprep.subr.bf16.mxu0 %v1814_v36 }
 0x157   :  { %1977 = vmatpush1.bf16.msra.mxu1 %v1816_v39 }
 0x158   :  { %1817 = vmatpush1.bf16.msra.mxu0 %v1816_v39  ;;  %1586 = vmatprep.subr.mxu1 %v2330_v42 }
 0x159   :  { %1606 = vmatprep.subr.mxu0 %v2330_v42 }
 0x15a   :  { %726 = vmatmul.mubr.f32.vlgmr.msra.gmra.mrb[4].mxu1 %v207_v41  ;;  %v563_v41 = vrot.slane %v2581_v48, %v2583_v50 }
 0x15b   :  { %1588 = vmatprep.mubr.msk.f32.mxu1 %vm2331_vm0, %v2330_v42  ;;  %720 = vmatmul.mubr.f32.vlgmr.msra.gmra.mrb[4].mxu0 %v205_v44 }
 0x15c   :  { %1608 = vmatprep.mubr.msk.f32.mxu0 %vm2331_vm0, %v2330_v42 }
 0x1ec   :  { %v632_v54 = vpop.f32.mrb[0].mxu1 }
 0x1ed   :  { %v633_v55 = vadd.f32 %v632_v54, %v559_v51  ;;  %v543_v56 = vpop.f32.mrb[0].mxu0  ;;  %v2589_v57 = vpop.f32.mrb[1].mxu1 }
 0x1ee   :  { %v544_v58 = vadd.f32 %v543_v56, %v470_v52  ;;  %v545_v59 = vpop.f32.mrb[1].mxu0  ;;  %v635_v45 = vadd.f32 %v2589_v57, %v563_v41 }
 0x1ef   :  { %v2591_v60 = vadd.f32 %v545_v59, %v474_v53  ;;  %1587 = vmatpush3.xpose.msra.mxu1 %v633_v55 }
 0x1f0   :  { %v732_v61 = vmul.f32 0.088388346, %v544_v58  ;;  %v638_v62 = vpop.f32.mrb[2].mxu1  ;;  %1591 = vmatprep.subr.mxu1 %v2330_v42 }
 0x1f1   :  { %v639_v63 = vadd.f32 %v638_v62, %v559_v51  ;;  %v549_v0 = vpop.f32.mrb[2].mxu0  ;;  %v2594_v1 = vpop.f32.mrb[3].mxu1  ;;  %v733_v51 = vmul.f32 0.088388346, %v2591_v60 }
 0x1f2   :  { %v550_v2 = vadd.f32 %v549_v0, %v470_v52  ;;  %v551_v3 = vpop.f32.mrb[3].mxu0  ;;  %1589 = vmatmul.mubr.f32.vlgmr.msra.gmra.mrb[6].mxu1 %v732_v61  ;;  %v641_v48 = vadd.f32 %v2594_v1, %v563_v41  ;;  %v415_v41 = vld [vmem:[#allocation19 + $0x70] sm:$0xff] }
 0x1f3   :  { %v2596_v4 = vadd.f32 %v551_v3, %v474_v53  ;;  %1607 = vmatpush3.xpose.msra.mxu0 %v639_v63  ;;  %1593 = vmatprep.mubr.msk.f32.mxu1 %vm2331_vm0, %v2330_v42 }
 0x1f4   :  { %v734_v5 = vmul.f32 0.088388346, %v550_v2  ;;  %1611 = vmatprep.subr.mxu0 %v2330_v42 }
 0x1f5   :  { %v735_v54 = vmul.f32 0.088388346, %v2596_v4 }
 0x1f6   :  { %1609 = vmatmul.mubr.f32.vlgmr.msra.gmra.mrb[6].mxu0 %v734_v5 }
 0x1f7   :  { %1613 = vmatprep.mubr.msk.f32.mxu0 %vm2331_vm0, %v2330_v42 }
 0x22d   :  { %v727_v8 = vpop.f32.mrb[4].mxu1 }
 0x22e   :  { %v728_v9 = vadd.f32 %v727_v8, %v648_v7  ;;  %v2604_v10 = vpop.f32.mrb[5].mxu1  ;;  %v721_v11 = vpop.f32.mrb[4].mxu0 }
 0x22f   :  { %v722_v12 = vadd.f32 %v721_v11, %v648_v7  ;;  %v723_v13 = vpop.f32.mrb[5].mxu0  ;;  %v730_v55 = vadd.f32 %v2604_v10, %v652_v49 }
 0x230   :  { %1612 = vmatpush3.msra.mxu0 %v728_v9  ;;  %v724_v53 = vadd.f32 %v723_v13, %v652_v49  ;;  %v402_v13 = vld [vmem:[#allocation19 + $0x8] sm:$0xff]  ;;  %v417_v49 = vld [vmem:[#allocation19 + $0x80] sm:$0xff] }
 0x231   :  { %1616 = vmatprep.subr.mxu0 %v2330_v42  ;;  %1592 = vmatpush3.msra.mxu1 %v722_v12  ;;  %v1818_v15 = vpack.c.bf16 %v404_v14, %v402_v13  ;;  %v440_v13 = vld [vmem:[#allocation19 + $0x138] sm:$0xff] }
 0x232   :  { %1596 = vmatprep.subr.mxu1 %v2330_v42 }
 0x2c5   :  { %v811_v20 = vpop.f32.mrb[6].mxu1 }
 0x2c6   :  { %v812_v21 = vadd.f32 %v811_v20, %v743_v18  ;;  %v1590_v22 = vpop.f32.mrb[7].mxu1  ;;  %v406_v20 = vld [vmem:[#allocation19 + $0x28] sm:$0xff] }
 0x2c8   :  { %v816_v24 = vsel %vm815_vm3, %v812_v21, -inf }
 0x2c9   :  { %v1215_v25 = vpop.f32.mrb[6].mxu0  ;;  %817 = vmax.xlane.f32.xlu0 %v816_v24 }
 0x2ca   :  { %v1216_v26 = vadd.f32 %v1215_v25, %v1147_v23  ;;  %v1610_v27 = vpop.f32.mrb[7].mxu0 }
 0x2cb   :  { %v407_v27 = vld [vmem:[#allocation19 + $0x30] sm:$0xff] }
 0x2cc   :  { %v1219_v28 = vsel %vm815_vm3, %v1216_v26, -inf }
 0x2cd   :  { %1220 = vmax.xlane.f32.xlu0 %v1219_v28  ;;  %v410_v28 = vld [vmem:[#allocation19 + $0x48] sm:$0xff] }
 0x356   :  { %v818_v29 = vpop.xlane.xlu0 %817 }
 0x357   :  { %v819_v30 = vsub.f32 %v812_v21, %v818_v29  ;;  %v408_v21 = vld [vmem:[#allocation19 + $0x38] sm:$0xff] }
 0x358   :  { %v1822_v25 = vpack.c.bf16 %v408_v21, %v406_v20  ;;  %v412_v29 = vld [vmem:[#allocation19 + $0x58] sm:$0xff] }
 0x359   :  { %v820_v31 = vmul.f32 1.442695, %v819_v30 }
 0x35a   :  { %v1221_v32 = vpop.xlane.xlu0 %1220 }
 0x35b   :  { %1997 = vpow2.f32 %v820_v31  ;;  %v1222_v33 = vsub.f32 %v1216_v26, %v1221_v32  ;;  %v405_v26 = vld [vmem:[#allocation19 + $0x20] sm:$0xff] }
 0x35c   :  { %v1824_v31 = vpack.c.bf16 %v407_v27, %v405_v26 }
 0x35d   :  { %v1223_v34 = vmul.f32 1.442695, %v1222_v33  ;;  %v1826_v33 = vpack.c.bf16 %v412_v29, %v410_v28  ;;  %v445_v28 = vld [vmem:[#allocation19 + $0x160] sm:$0xff]  ;;  %v447_v29 = vld [vmem:[#allocation19 + $0x170] sm:$0xff] }
 0x35f   :  { %1999 = vpow2.f32 %v1223_v34  ;;  %v409_v34 = vld [vmem:[#allocation19 + $0x40] sm:$0xff] }
 0x365   :  { %v1998_v35 = vpop.eup %1997 }
 0x366   :  { %v822_v36 = vsel %vm815_vm3, %v1998_v35, 0.0 }
 0x367   :  { %823 = vadd.xlane.f32.xlu1 %v822_v36  ;;  %v414_v36 = vld [vmem:[#allocation19 + $0x68] sm:$0xff] }
 0x369   :  { %v2000_v37 = vpop.eup %1999 }
 0x36a   :  { %v1225_v38 = vsel %vm815_vm3, %v2000_v37, 0.0 }
 0x36b   :  { %1226 = vadd.xlane.f32.xlu1 %v1225_v38 }
 0x3f4   :  { %v824_v39 = vpop.xlane.xlu1 %823 }
 0x3f5   :  { %2001 = vrcp.f32 %v824_v39 }
 0x3f8   :  { %v1227_v40 = vpop.xlane.xlu1 %1226 }
 0x3f9   :  { %2003 = vrcp.f32 %v1227_v40  ;;  %v413_v40 = vld [vmem:[#allocation19 + $0x60] sm:$0xff] }
 0x3ff   :  { %v2002_v43 = vpop.eup %2001 }
 0x400   :  { %v826_v44 = vmul.f32 %v2002_v43, %v1998_v35  ;;  %v411_v35 = vld [vmem:[#allocation19 + $0x50] sm:$0xff]  ;;  %v418_v43 = vld [vmem:[#allocation19 + $0x88] sm:$0xff] }
 0x401   :  { %v1828_v38 = vpack.c.bf16 %v411_v35, %v409_v34  ;;  %v449_v34 = vld [vmem:[#allocation19 + $0x180] sm:$0xff]  ;;  %v451_v35 = vld [vmem:[#allocation19 + $0x190] sm:$0xff] }
 0x402   :  { %1594 = vmatmul.mubr.msk.f32.vlgmr.msra.gmra.mrb[8].mxu1 %vm815_vm3, %v826_v44  ;;  %v420_v44 = vld [vmem:[#allocation19 + $0x98] sm:$0xff] }
 0x403   :  { %v2004_v46 = vpop.eup %2003  ;;  %1597 = vmatpush3.xpose.msra.mxu1 %v635_v45  ;;  %1598 = vmatprep.mubr.msk.f32.mxu1 %vm2331_vm0, %v2330_v42  ;;  %v1832_v45 = vpack.c.bf16 %v415_v41, %v413_v40  ;;  %v453_v40 = vld [vmem:[#allocation19 + $0x1a0] sm:$0xff]  ;;  %v455_v41 = vld [vmem:[#allocation19 + $0x1b0] sm:$0xff] }
 0x404   :  { %v1229_v52 = vmul.f32 %v2004_v46, %v2000_v37  ;;  %1601 = vmatprep.subr.mxu1 %v2330_v42  ;;  %v416_v37 = vld [vmem:[#allocation19 + $0x78] sm:$0xff]  ;;  %v1834_v46 = vpack.c.bf16 %v420_v44, %v418_v43  ;;  %v458_v43 = vld [vmem:[#allocation19 + $0x1c8] sm:$0xff] }
 0x405   :  { %v1830_v39 = vpack.c.bf16 %v416_v37, %v414_v36  ;;  %v454_v36 = vld [vmem:[#allocation19 + $0x1a8] sm:$0xff]  ;;  %v456_v37 = vld [vmem:[#allocation19 + $0x1b8] sm:$0xff] }
 0x406   :  { %1599 = vmatmul.mubr.f32.vlgmr.msra.gmra.mrb[10].mxu1 %v733_v51  ;;  %1614 = vmatmul.mubr.msk.f32.vlgmr.msra.gmra.mrb[8].mxu0 %vm815_vm3, %v1229_v52  ;;  %v419_v51 = vld [vmem:[#allocation19 + $0x90] sm:$0xff]  ;;  %v422_v52 = vld [vmem:[#allocation19 + $0xa8] sm:$0xff]  ;;  %v460_v44 = vld [vmem:[#allocation19 + $0x1d8] sm:$0xff] }
 0x407   :  { %1602 = vmatpush3.msra.mxu1 %v724_v53  ;;  %1617 = vmatpush3.xpose.msra.mxu0 %v641_v48  ;;  %v424_v48 = vld [vmem:[#allocation19 + $0xb8] sm:$0xff]  ;;  %v1836_v53 = vpack.c.bf16 %v419_v51, %v417_v49  ;;  %v457_v49 = vld [vmem:[#allocation19 + $0x1c0] sm:$0xff]  ;;  %v459_v51 = vld [vmem:[#allocation19 + $0x1d0] sm:$0xff] }
 0x408   :  { %1618 = vmatprep.mubr.msk.f32.mxu0 %vm2331_vm0, %v2330_v42  ;;  %1621 = vmatprep.subr.mxu0 %v2330_v42 }
 0x409   :  { %1603 = vmatprep.mubr.msk.f32.mxu1 %vm2331_vm0, %v2330_v42  ;;  %1819 = vmatprep.subr.bf16.mxu1 %v1818_v15 }
 0x40a   :  { %1619 = vmatmul.mubr.f32.vlgmr.msra.gmra.mrb[10].mxu0 %v735_v54  ;;  %v1838_v54 = vpack.c.bf16 %v424_v48, %v422_v52  ;;  %v462_v52 = vld [vmem:[#allocation19 + $0x1e8] sm:$0xff]  ;;  %v464_v48 = vld [vmem:[#allocation19 + $0x1f8] sm:$0xff] }
 0x40b   :  { %1622 = vmatpush3.msra.mxu0 %v730_v55  ;;  %1623 = vmatprep.mubr.msk.f32.mxu0 %vm2331_vm0, %v2330_v42  ;;  %v421_v55 = vld [vmem:[#allocation19 + $0xa0] sm:$0xff] }
 0x40c   :  { %1883 = vmatprep.subr.bf16.mxu0 %v1818_v15 }
 0x4d5   :  { %v2634_v56 = vpop.f32.mrb[8].mxu1 }
 0x4d6   :  { %v1595_v57 = vpop.f32.mrb[9].mxu1 }
 0x4d7   :  { %v423_v57 = vld [vmem:[#allocation19 + $0xb0] sm:$0xff] }
 0x4d9   :  { %v966_v58 = vpop.f32.mrb[10].mxu1  ;;  %v2636_v59 = vpop.f32.mrb[8].mxu0 }
 0x4da   :  { %v967_v60 = vadd.f32 %v966_v58, %v743_v18  ;;  %v1600_v61 = vpop.f32.mrb[11].mxu1  ;;  %v1615_v62 = vpop.f32.mrb[9].mxu0  ;;  %v401_v18 = vld [vmem:[#allocation19] sm:$0xff]  ;;  %v426_v58 = vld [vmem:[#allocation19 + $0xc8] sm:$0xff] }
 0x4db   :  { %v1840_v61 = vpack.c.bf16 %v423_v57, %v421_v55  ;;  %v461_v55 = vld [vmem:[#allocation19 + $0x1e0] sm:$0xff]  ;;  %v463_v57 = vld [vmem:[#allocation19 + $0x1f0] sm:$0xff] }
 0x4dc   :  { %v970_v63 = vsel %vm815_vm3, %v967_v60, -inf }
 0x4dd   :  { %v1369_v0 = vpop.f32.mrb[10].mxu0  ;;  %971 = vmax.xlane.f32.xlu0 %v970_v63  ;;  %v425_v63 = vld [vmem:[#allocation19 + $0xc0] sm:$0xff] }
 0x4de   :  { %v1370_v1 = vadd.f32 %v1369_v0, %v1147_v23  ;;  %v1620_v2 = vpop.f32.mrb[11].mxu0  ;;  %v1820_v23 = vpack.c.bf16 %v403_v19, %v401_v18  ;;  %v427_v0 = vld [vmem:[#allocation19 + $0xd0] sm:$0xff]  ;;  %v442_v18 = vld [vmem:[#allocation19 + $0x148] sm:$0xff]  ;;  %v444_v19 = vld [vmem:[#allocation19 + $0x158] sm:$0xff] }
 0x4df   :  { %v432_v2 = vld [vmem:[#allocation19 + $0xf8] sm:$0xff]  ;;  %v1858_v21 = vpack.c.bf16 %v444_v19, %v442_v18 }
 0x4e0   :  { %v1373_v3 = vsel %vm815_vm3, %v1370_v1, -inf }
 0x4e1   :  { %1374 = vmax.xlane.f32.xlu1 %v1373_v3  ;;  %v1844_v3 = vpack.c.bf16 %v427_v0, %v425_v63  ;;  %v1054_v0 = vld [vmem:[#allocation20] sm:$0x3] }
 0x56a   :  { %v972_v4 = vpop.xlane.xlu0 %971 }
 0x56b   :  { %v973_v42 = vsub.f32 %v967_v60, %v972_v4  ;;  %v428_v60 = vld [vmem:[#allocation19 + $0xd8] sm:$0xff] }
 0x56c   :  { %v1842_v62 = vpack.c.bf16 %v428_v60, %v426_v58  ;;  %v1880_v58 = vpack.c.bf16 %v463_v57, %v461_v55 }
 0x56d   :  { %v974_v5 = vmul.f32 1.442695, %v973_v42  ;;  %v429_v42 = vld [vmem:[#allocation19 + $0xe0] sm:$0xff] }
 0x56e   :  { %v1375_v6 = vpop.xlane.xlu1 %1374 }
 0x56f   :  { %2005 = vpow2.f32 %v974_v5  ;;  %v1376_v7 = vsub.f32 %v1370_v1, %v1375_v6  ;;  %v430_v1 = vld [vmem:[#allocation19 + $0xe8] sm:$0xff]  ;;  %v431_v5 = vld [vmem:[#allocation19 + $0xf0] sm:$0xff] }
 0x570   :  { %v1846_v4 = vpack.c.bf16 %v432_v2, %v430_v1  ;;  %v434_v6 = vld [vmem:[#allocation19 + $0x108] sm:$0xff]  ;;  %v1059_v1 = vrot.slane %v1054_v0, %v2579_v47  ;;  %v1063_v2 = vrot.slane %v1054_v0, %v2583_v50 }
 0x571   :  { %v1377_v8 = vmul.f32 1.442695, %v1376_v7  ;;  %v436_v7 = vld [vmem:[#allocation19 + $0x118] sm:$0xff] }
 0x573   :  { %2007 = vpow2.f32 %v1377_v8  ;;  %v1848_v8 = vpack.c.bf16 %v431_v5, %v429_v42 }
 0x579   :  { %v2006_v9 = vpop.eup %2005 }
 0x57a   :  { %v976_v10 = vsel %vm815_vm3, %v2006_v9, 0.0 }
 0x57b   :  { %977 = vadd.xlane.f32.xlu0 %v976_v10  ;;  %v433_v10 = vld [vmem:[#allocation19 + $0x100] sm:$0xff] }
 0x57d   :  { %v2008_v11 = vpop.eup %2007 }
 0x57e   :  { %v1379_v12 = vsel %vm815_vm3, %v2008_v11, 0.0 }
 0x57f   :  { %1380 = vadd.xlane.f32.xlu1 %v1379_v12  ;;  %v438_v12 = vld [vmem:[#allocation19 + $0x128] sm:$0xff] }
 0x580   :  { %v1854_v15 = vpack.c.bf16 %v440_v13, %v438_v12 }
 0x608   :  { %v978_v16 = vpop.xlane.xlu0 %977 }
 0x609   :  { %2009 = vrcp.f32 %v978_v16  ;;  %v437_v16 = vld [vmem:[#allocation19 + $0x120] sm:$0xff] }
 0x60c   :  { %v1381_v17 = vpop.xlane.xlu1 %1380 }
 0x60d   :  { %2011 = vrcp.f32 %v1381_v17  ;;  %v439_v17 = vld [vmem:[#allocation19 + $0x130] sm:$0xff] }
 0x60e   :  { %v1856_v20 = vpack.c.bf16 %v439_v17, %v437_v16 }
 0x613   :  { %v2010_v22 = vpop.eup %2009 }
 0x614   :  { %v980_v24 = vmul.f32 %v2010_v22, %v2006_v9  ;;  %v1850_v9 = vpack.c.bf16 %v436_v7, %v434_v6  ;;  %v441_v22 = vld [vmem:[#allocation19 + $0x140] sm:$0xff] }
 0x616   :  { %1604 = vmatmul.mubr.msk.f32.vlgmr.msra.gmra.mrb[12].mxu1 %vm815_vm3, %v980_v24  ;;  %v446_v24 = vld [vmem:[#allocation19 + $0x168] sm:$0xff] }
 0x617   :  { %v2012_v30 = vpop.eup %2011  ;;  %1821 = vmatpush1.bf16.msra.mxu1 %v1820_v23 }
 0x618   :  { %v1383_v32 = vmul.f32 %v2012_v30, %v2008_v11  ;;  %1823 = vmatprep.subr.bf16.mxu1 %v1822_v25  ;;  %v435_v11 = vld [vmem:[#allocation19 + $0x110] sm:$0xff]  ;;  %v450_v30 = vld [vmem:[#allocation19 + $0x188] sm:$0xff] }
 0x619   :  { %v1852_v14 = vpack.c.bf16 %v435_v11, %v433_v10 }
 0x61a   :  { %1624 = vmatmul.mubr.msk.f32.vlgmr.msra.gmra.mrb[12].mxu0 %vm815_vm3, %v1383_v32  ;;  %v1864_v32 = vpack.c.bf16 %v447_v29, %v445_v28 }
 0x61b   :  { %1825 = vmatpush1.bf16.msra.mxu1 %v1824_v31  ;;  %1885 = vmatpush1.bf16.msra.mxu0 %v1820_v23  ;;  %v443_v23 = vld [vmem:[#allocation19 + $0x150] sm:$0xff] }
 0x61c   :  { %1827 = vmatprep.subr.bf16.mxu1 %v1826_v33  ;;  %1887 = vmatprep.subr.bf16.mxu0 %v1822_v25  ;;  %v448_v25 = vld [vmem:[#allocation19 + $0x178] sm:$0xff]  ;;  %v1860_v26 = vpack.c.bf16 %v443_v23, %v441_v22 }
 0x61d   :  { %v1862_v27 = vpack.c.bf16 %v448_v25, %v446_v24 }
 0x61f   :  { %1829 = vmatpush1.bf16.msra.mxu1 %v1828_v38  ;;  %1889 = vmatpush1.bf16.msra.mxu0 %v1824_v31  ;;  %v452_v31 = vld [vmem:[#allocation19 + $0x198] sm:$0xff] }
 0x620   :  { %1831 = vmatprep.subr.bf16.mxu1 %v1830_v39  ;;  %1891 = vmatprep.subr.bf16.mxu0 %v1826_v33  ;;  %v1866_v33 = vpack.c.bf16 %v452_v31, %v450_v30 }
 0x623   :  { %1833 = vmatpush1.bf16.msra.mxu1 %v1832_v45  ;;  %1893 = vmatpush1.bf16.msra.mxu0 %v1828_v38  ;;  %v1868_v38 = vpack.c.bf16 %v451_v35, %v449_v34 }
 0x624   :  { %1835 = vmatprep.subr.bf16.mxu1 %v1834_v46  ;;  %1895 = vmatprep.subr.bf16.mxu0 %v1830_v39  ;;  %v1870_v39 = vpack.c.bf16 %v456_v37, %v454_v36 }
 0x627   :  { %1837 = vmatpush1.bf16.msra.mxu1 %v1836_v53  ;;  %1897 = vmatpush1.bf16.msra.mxu0 %v1832_v45  ;;  %v1872_v45 = vpack.c.bf16 %v455_v41, %v453_v40 }
 0x628   :  { %1839 = vmatprep.subr.bf16.mxu1 %v1838_v54  ;;  %1899 = vmatprep.subr.bf16.mxu0 %v1834_v46  ;;  %v1874_v46 = vpack.c.bf16 %v460_v44, %v458_v43 }
 0x62b   :  { %1841 = vmatpush1.bf16.msra.mxu1 %v1840_v61  ;;  %1901 = vmatpush1.bf16.msra.mxu0 %v1836_v53  ;;  %v1876_v53 = vpack.c.bf16 %v459_v51, %v457_v49 }
 0x62c   :  { %1843 = vmatprep.subr.bf16.mxu1 %v1842_v62  ;;  %1903 = vmatprep.subr.bf16.mxu0 %v1838_v54  ;;  %v1878_v54 = vpack.c.bf16 %v464_v48, %v462_v52 }
 0x62f   :  { %1845 = vmatpush1.bf16.msra.mxu1 %v1844_v3  ;;  %1905 = vmatpush1.bf16.msra.mxu0 %v1840_v61 }
 0x630   :  { %1847 = vmatprep.subr.bf16.mxu1 %v1846_v4  ;;  %1907 = vmatprep.subr.bf16.mxu0 %v1842_v62 }
 0x633   :  { %1849 = vmatpush1.bf16.msra.mxu1 %v1848_v8  ;;  %1909 = vmatpush1.bf16.msra.mxu0 %v1844_v3  ;;  %v1457_v3 = vld [vmem:[#allocation20] sm:$0x3] }
 0x634   :  { %1851 = vmatprep.subr.bf16.mxu1 %v1850_v9  ;;  %1911 = vmatprep.subr.bf16.mxu0 %v1846_v4  ;;  %v1462_v6 = vrot.slane %v1457_v3, %v2579_v47 }
 0x637   :  { %1853 = vmatpush1.bf16.msra.mxu1 %v1852_v14  ;;  %1913 = vmatpush1.bf16.msra.mxu0 %v1848_v8  ;;  %v1466_v8 = vrot.slane %v1457_v3, %v2583_v50 }
 0x638   :  { %1855 = vmatprep.subr.bf16.mxu1 %v1854_v15  ;;  %1915 = vmatprep.subr.bf16.mxu0 %v1850_v9 }
 0x63b   :  { %1857 = vmatpush1.bf16.msra.mxu1 %v1856_v20  ;;  %1917 = vmatpush1.bf16.msra.mxu0 %v1852_v14 }
 0x63c   :  { %1859 = vmatprep.subr.bf16.mxu1 %v1858_v21  ;;  %1919 = vmatprep.subr.bf16.mxu0 %v1854_v15 }
 0x63f   :  { %1861 = vmatpush1.bf16.msra.mxu1 %v1860_v26  ;;  %1921 = vmatpush1.bf16.msra.mxu0 %v1856_v20 }
 0x640   :  { %1863 = vmatprep.subr.bf16.mxu1 %v1862_v27  ;;  %1923 = vmatprep.subr.bf16.mxu0 %v1858_v21 }
 0x643   :  { %1865 = vmatpush1.bf16.msra.mxu1 %v1864_v32  ;;  %1925 = vmatpush1.bf16.msra.mxu0 %v1860_v26 }
 0x644   :  { %1867 = vmatprep.subr.bf16.mxu1 %v1866_v33  ;;  %1927 = vmatprep.subr.bf16.mxu0 %v1862_v27 }
 0x647   :  { %1869 = vmatpush1.bf16.msra.mxu1 %v1868_v38  ;;  %1929 = vmatpush1.bf16.msra.mxu0 %v1864_v32 }
 0x648   :  { %1871 = vmatprep.subr.bf16.mxu1 %v1870_v39  ;;  %1931 = vmatprep.subr.bf16.mxu0 %v1866_v33 }
 0x64b   :  { %1873 = vmatpush1.bf16.msra.mxu1 %v1872_v45  ;;  %1933 = vmatpush1.bf16.msra.mxu0 %v1868_v38 }
 0x64c   :  { %1875 = vmatprep.subr.bf16.mxu1 %v1874_v46  ;;  %1935 = vmatprep.subr.bf16.mxu0 %v1870_v39 }
 0x64f   :  { %1877 = vmatpush1.bf16.msra.mxu1 %v1876_v53  ;;  %1937 = vmatpush1.bf16.msra.mxu0 %v1872_v45 }
 0x650   :  { %1879 = vmatprep.subr.bf16.mxu1 %v1878_v54  ;;  %1939 = vmatprep.subr.bf16.mxu0 %v1874_v46 }
 0x653   :  { %1881 = vmatpush1.bf16.msra.mxu1 %v1880_v58  ;;  %1941 = vmatpush1.bf16.msra.mxu0 %v1876_v53 }
 0x654   :  { %1943 = vmatprep.subr.bf16.mxu0 %v1878_v54 }
 0x657   :  { %1945 = vmatpush1.bf16.msra.mxu0 %v1880_v58 }
 0x6e9   :  { %v1050_v60 = vpop.f32.mrb[12].mxu1 }
 0x6ea   :  { %v1605_v61 = vpop.f32.mrb[13].mxu1  ;;  %1130 = vmatprep.mubr.f32.mxu1 %v1050_v60 }
 0x6eb   :  { %1131 = vmatmul.mubr.f32.vlgmr.msra.gmra.mrb[14].mxu1 %v2634_v56 }
 0x6ed   :  { %v1453_v62 = vpop.f32.mrb[12].mxu0 }
 0x6ee   :  { %v1625_v63 = vpop.f32.mrb[13].mxu0  ;;  %1533 = vmatprep.mubr.f32.mxu0 %v1453_v62 }
 0x6ef   :  { %1534 = vmatmul.mubr.f32.vlgmr.msra.gmra.mrb[14].mxu0 %v2636_v59 }
 0x7be   :  { %v1132_v4 = vpop.f32.mrb[14].mxu1 }
 0x7bf   :  { %v1133_v42 = vadd.f32 %v1132_v4, %v1059_v1  ;;  %v1134_v5 = vpop.f32.mrb[15].mxu1 }
 0x7c0   :  { %v1135_v7 = vadd.f32 %v1134_v5, %v1063_v2 }
 0x7c1   :  { %1137 = vst [vmem:[#allocation22] sm:$0xff] %v1133_v42 }
 0x7c2   :  { %1138 = vst [vmem:[#allocation22 + $0x8] sm:$0xff] %v1135_v7  ;;  %v1535_v56 = vpop.f32.mrb[14].mxu0 }
 0x7c3   :  { %v1536_v59 = vadd.f32 %v1535_v56, %v1462_v6  ;;  %v1537_v9 = vpop.f32.mrb[15].mxu0 }
 0x7c4   :  { %v1538_v10 = vadd.f32 %v1537_v9, %v1466_v8 }
 0x7c5   :  { %1541 = vst [vmem:[#allocation22 + $0x10] sm:$0xff] %v1536_v59 }
 0x7c6   :  { %1542 = vst [vmem:[#allocation22 + $0x18] sm:$0xff] %v1538_v10 }
 0x7c7   :  { %2288 = shalt.err (!%p2285_p2)
}
 0x7c8   :  { %s2289_s3 = scalar_lea.hbm %s2677_s12, 512 }
 0x7c9   :  { %p2290_p3 = scmp.ne.s32.totalorder %s2677_s12, %s2289_s3  ;;  %p2293_p4 = scmp.lt.u32.totalorder %s2289_s3, %s2677_s12 }
 0x7cb   :  { %p2295_p5 = pnand %p2293_p4, %p2290_p3 }
 0x7cd   :  { %2298 = shalt.err (!%p2295_p5)
}
 0x7ce   :  { %1554 = dma.vmem_to_hbm [thread:$0]  %s1549_s21, 512, %s2677_s12, [#allocation4], %s2317_s15, %s2317_s15, %s2318_s16  }
 0x7cf   :  { %2313 = dma.done.wait [#allocation4], 512  }
 0x7d0   :  { %2314 = vsyncadd [#allocation4], 4294966784 }
 0x7d1   :  { %1558 = vsyncpa [#allocation3], 1 }
 0x7d2   :  { %1559 = vsyncpa [#allocation6], 1 }
 0x7d3   :  { %1560 = vsyncpa [#allocation9], 1 }
 0x7d4   :  { %1561 = vsyncpa [#allocation12], 1 }
 0x7d5   :  { %1562 = vsyncpa [#allocation15], 1 }
 0x7d6   :  { %1563 = vsyncpa [#allocation18], 1 }
 0x7d7   :  { %1564 = vsyncpa [#allocation21], 1 }
 0x7d8   :  { %1565 = vsyncpa [#allocation4], 1 }

</bundles_post_ra>
